<compile_context>
chip_gen: v5e
topology: v5e:2x2
jax: 0.10.0
libtpu: 0.0.40
codegen_flags: <defaults>
</compile_context>

<pallas_src>
import math

import numpy as np
import jax
import jax.numpy as jnp
from jax import lax
from jax.experimental import pallas as pl
from jax.experimental.pallas import tpu as pltpu

# ----------------------------- Config (Config.* of the PyTorch spec) ----------
D_MODEL = 32
N_HEADS = 4
D_K = D_MODEL // N_HEADS
D_FFN = 64
N_LAYERS = 2
VOCAB = 16
BATCH = 2
SEQ = 8
LN_EPS = 1e-5

BS = BATCH * SEQ               # rows of the folded (batch*seq, d_model) slab
BHS = BATCH * N_HEADS * SEQ    # rows of the head-replicated slab

# ---- weight slab layout: every weight block starts on a 128-lane boundary ----
W_ROWS = max(D_MODEL, D_FFN)   # 64
W_COLS = 512
OFF_WQKV, OFF_WO, OFF_W1, OFF_W2 = 0, 128, 256, 384

# ---- bias / LN slab layout: one (8, 128) page per layer (+1 page final LN) ---
ROW_BQKV, ROW_BO, ROW_B1, ROW_B2 = 0, 1, 2, 3
ROW_G1, ROW_BE1, ROW_G2, ROW_BE2 = 4, 5, 6, 7

CONST_COLS = 128 + BS          # [head_mask (0:32) | pad | R (128:128+BS)]


# --------------------------- kernel helpers -----------------------------------
def _layernorm(x, gamma, beta):
    mu = jnp.mean(x, axis=-1, keepdims=True)
    var = jnp.mean((x - mu) ** 2, axis=-1, keepdims=True)
    return (x - mu) * lax.rsqrt(var + LN_EPS) * gamma + beta


# --------------------------- fused encoder kernel -----------------------------
def encoder_kernel(x0_ref, bias_ref, const_ref, rt_ref, w_ref, b_ref, o_ref):
    x = x0_ref[...]                                   # (BS, D)   embedded + pos-enc
    bias = bias_ref[...]                              # (BHS, BHS) pad + block bias
    head_mask = const_ref[:, 0:D_MODEL]               # (BHS, D)  {0,1}
    R = const_ref[:, 128:128 + BS]                    # (BHS, BS) replication matrix
    Rt = rt_ref[...]                                  # (BS, BHS) collapse matrix

    # ---- encoder layers (statically unrolled) ---------------------------------
    for li in range(N_LAYERS):
        wqkv = w_ref[li, 0:D_MODEL, OFF_WQKV:OFF_WQKV + 3 * D_MODEL]   # (D, 3D)
        wo = w_ref[li, 0:D_MODEL, OFF_WO:OFF_WO + D_MODEL]             # (D, D)
        w1 = w_ref[li, 0:D_MODEL, OFF_W1:OFF_W1 + D_FFN]               # (D, F)
        w2 = w_ref[li, 0:D_FFN, OFF_W2:OFF_W2 + D_MODEL]               # (F, D)
        bqkv = b_ref[li, ROW_BQKV:ROW_BQKV + 1, 0:3 * D_MODEL]         # (1, 3D)
        bo = b_ref[li, ROW_BO:ROW_BO + 1, 0:D_MODEL]
        b1 = b_ref[li, ROW_B1:ROW_B1 + 1, 0:D_FFN]
        b2 = b_ref[li, ROW_B2:ROW_B2 + 1, 0:D_MODEL]
        g1 = b_ref[li, ROW_G1:ROW_G1 + 1, 0:D_MODEL]
        be1 = b_ref[li, ROW_BE1:ROW_BE1 + 1, 0:D_MODEL]
        g2 = b_ref[li, ROW_G2:ROW_G2 + 1, 0:D_MODEL]
        be2 = b_ref[li, ROW_BE2:ROW_BE2 + 1, 0:D_MODEL]

        # pre-norm + multi-head self-attention (block-diagonal formulation)
        xn = _layernorm(x, g1, be1)                                    # (BS, D)
        # small QKV matmul first, then replicate rows per head via R (MXU)
        qkv_s = jnp.dot(xn, wqkv, preferred_element_type=jnp.float32) + bqkv  # (BS, 3D)
        qkv = jnp.dot(R, qkv_s, preferred_element_type=jnp.float32)          # (BHS, 3D)
        q = qkv[:, 0:D_MODEL] * head_mask      # 1/sqrt(d_k) pre-folded into Wq/bq
        k = qkv[:, D_MODEL:2 * D_MODEL]
        v = qkv[:, 2 * D_MODEL:3 * D_MODEL]

        # score[r, c] = <q_r, k_c>  (only head-h columns survive via head_mask on q)
        score = lax.dot_general(q, k, (((1,), (1,)), ((), ())),
                                preferred_element_type=jnp.float32)    # (BHS, BHS)
        score = score + bias                    # pad keys (-1e9) + cross-block (-2e9)
        score = score - jnp.max(score, axis=-1, keepdims=True)
        p = jnp.exp(score)
        p = p * pl.reciprocal(jnp.sum(p, axis=-1, keepdims=True), approx=True)

        att = jnp.dot(p, v, preferred_element_type=jnp.float32) * head_mask   # (BHS, D)
        # collapse the N_HEADS row-blocks of each batch back to (BS, D) via Rt (MXU)
        att_bs = jnp.dot(Rt, att, preferred_element_type=jnp.float32)         # (BS, D)
        att_o = jnp.dot(att_bs, wo, preferred_element_type=jnp.float32) + bo
        y = x + att_o                                                  # residual 1

        # pre-norm + position-wise FFN
        yn = _layernorm(y, g2, be2)
        h1 = jnp.maximum(
            jnp.dot(yn, w1, preferred_element_type=jnp.float32) + b1, 0.0)    # ReLU
        ffn = jnp.dot(h1, w2, preferred_element_type=jnp.float32) + b2
        x = y + ffn                                                    # residual 2

    # ---- final LayerNorm -------------------------------------------------------
    gf = b_ref[N_LAYERS, 0:1, 0:D_MODEL]
    bf = b_ref[N_LAYERS, 1:2, 0:D_MODEL]
    o_ref[...] = _layernorm(x, gf, bf)


# --------------------------- wrapper -------------------------------------------
@jax.jit
def encoder_forward(ids, emb_scaled, pe_seq, blk_bias, const, rt, wslab, bslab):
    # embedding (sqrt(d_model) pre-folded) + positional encoding, folded to (BS, D)
    x0 = (emb_scaled[ids] + pe_seq[None, :, :]).reshape(BS, D_MODEL)
    # full additive attention bias: key-pad fill + structural block bias
    pad = (ids == 0)                                                   # (B, S)
    pad_keys = jnp.broadcast_to(pad[:, None, :],
                                (BATCH, N_HEADS, SEQ)).reshape(1, BHS)
    bias = blk_bias + jnp.where(pad_keys, jnp.float32(-1e9), jnp.float32(0.0))

    vmem = pl.BlockSpec(memory_space=pltpu.MemorySpace.VMEM)
    operands = (x0, bias, const, rt, wslab, bslab)
    out = pl.pallas_call(
        encoder_kernel,
        out_shape=jax.ShapeDtypeStruct((BS, D_MODEL), jnp.float32),
        in_specs=[vmem] * len(operands),
        out_specs=vmem,
    )(*operands)
    return out.reshape(BATCH, SEQ, D_MODEL)


# --------------------------- static constants ------------------------------------
def build_static_constants():
    r = np.arange(BHS)
    row_head = (r // SEQ) % N_HEADS
    col_head = np.arange(D_MODEL) // D_K
    head_mask = (row_head[:, None] == col_head[None, :]).astype(np.float32)  # (BHS, D)

    rb = r // SEQ
    blk_bias = np.where(rb[:, None] == rb[None, :], 0.0, -2e9).astype(np.float32)

    # replication matrix: row (b, h, s) of the head-replicated slab <- row (b, s)
    src = (r // (N_HEADS * SEQ)) * SEQ + (r % SEQ)
    R = np.zeros((BHS, BS), np.float32)
    R[r, src] = 1.0

    const = np.zeros((BHS, CONST_COLS), np.float32)
    const[:, 0:D_MODEL] = head_mask
    const[:, 128:128 + BS] = R
    rt = np.ascontiguousarray(R.T)                                    # (BS, BHS)
    return jnp.asarray(blk_bias), jnp.asarray(const), jnp.asarray(rt)


# --------------------------- parameter packing ------------------------------------
def pack_params(layers, gf, bf):
    s = 1.0 / math.sqrt(D_K)                 # fold score scale into Wq / bq
    wslab = np.zeros((N_LAYERS, W_ROWS, W_COLS), np.float32)
    bslab = np.zeros((N_LAYERS + 1, 8, 128), np.float32)
    for li, p in enumerate(layers):
        wqkv = np.concatenate([np.asarray(p["wq"]) * s,
                               np.asarray(p["wk"]),
                               np.asarray(p["wv"])], axis=1)          # (D, 3D)
        wslab[li, 0:D_MODEL, OFF_WQKV:OFF_WQKV + 3 * D_MODEL] = wqkv
        wslab[li, 0:D_MODEL, OFF_WO:OFF_WO + D_MODEL] = np.asarray(p["wo"])
        wslab[li, 0:D_MODEL, OFF_W1:OFF_W1 + D_FFN] = np.asarray(p["w1"])
        wslab[li, 0:D_FFN, OFF_W2:OFF_W2 + D_MODEL] = np.asarray(p["w2"])

        bqkv = np.concatenate([np.asarray(p["bq"]) * s,
                               np.asarray(p["bk"]),
                               np.asarray(p["bv"])], axis=1)          # (1, 3D)
        bslab[li, ROW_BQKV, 0:3 * D_MODEL] = bqkv[0]
        bslab[li, ROW_BO, 0:D_MODEL] = np.asarray(p["bo"])[0]
        bslab[li, ROW_B1, 0:D_FFN] = np.asarray(p["b1"])[0]
        bslab[li, ROW_B2, 0:D_MODEL] = np.asarray(p["b2"])[0]
        bslab[li, ROW_G1, 0:D_MODEL] = np.asarray(p["g1"])[0]
        bslab[li, ROW_BE1, 0:D_MODEL] = np.asarray(p["be1"])[0]
        bslab[li, ROW_G2, 0:D_MODEL] = np.asarray(p["g2"])[0]
        bslab[li, ROW_BE2, 0:D_MODEL] = np.asarray(p["be2"])[0]
    bslab[N_LAYERS, 0, 0:D_MODEL] = np.asarray(gf)[0]
    bslab[N_LAYERS, 1, 0:D_MODEL] = np.asarray(bf)[0]
    return jnp.asarray(wslab), jnp.asarray(bslab)


# --------------------------- init ------------------------------------------------
def positional_encoding(max_len, d_model):
    pos = np.arange(max_len, dtype=np.float32)[:, None]
    div = np.exp(np.arange(0, d_model, 2, dtype=np.float32) *
                 (-math.log(10000.0) / d_model))
    pe = np.zeros((max_len, d_model), np.float32)
    pe[:, 0::2] = np.sin(pos * div)
    pe[:, 1::2] = np.cos(pos * div)
    return jnp.asarray(pe)


def init_params(key):
    def rnd(k, shape, scale):
        return jax.random.normal(k, shape, jnp.float32) * scale

    keys = jax.random.split(key, 2 + N_LAYERS)
    emb = rnd(keys[0], (VOCAB, D_MODEL), 1.0)
    kf = jax.random.split(keys[1], 2)
    gf = 1.0 + rnd(kf[0], (1, D_MODEL), 0.05)
    bf = rnd(kf[1], (1, D_MODEL), 0.02)

    layers = []
    for li in range(N_LAYERS):
        ks = jax.random.split(keys[2 + li], 16)
        layers.append(dict(
            wq=rnd(ks[0], (D_MODEL, D_MODEL), 0.08),  bq=rnd(ks[1], (1, D_MODEL), 0.02),
            wk=rnd(ks[2], (D_MODEL, D_MODEL), 0.08),  bk=rnd(ks[3], (1, D_MODEL), 0.02),
            wv=rnd(ks[4], (D_MODEL, D_MODEL), 0.08),  bv=rnd(ks[5], (1, D_MODEL), 0.02),
            wo=rnd(ks[6], (D_MODEL, D_MODEL), 0.08),  bo=rnd(ks[7], (1, D_MODEL), 0.02),
            w1=rnd(ks[8], (D_MODEL, D_FFN), 0.08),    b1=rnd(ks[9], (1, D_FFN), 0.02),
            w2=rnd(ks[10], (D_FFN, D_MODEL), 0.08),   b2=rnd(ks[11], (1, D_MODEL), 0.02),
            g1=1.0 + rnd(ks[12], (1, D_MODEL), 0.05), be1=rnd(ks[13], (1, D_MODEL), 0.02),
            g2=1.0 + rnd(ks[14], (1, D_MODEL), 0.05), be2=rnd(ks[15], (1, D_MODEL), 0.02),
        ))
    return emb, layers, gf, bf


# --------------------------- pure-JAX reference (mirrors the PyTorch module) ------
def _ln_ref(x, g, b):
    mu = jnp.mean(x, -1, keepdims=True)
    var = jnp.mean((x - mu) ** 2, -1, keepdims=True)
    return (x - mu) * lax.rsqrt(var + LN_EPS) * g + b


def reference_forward(ids, emb, pe, layers, gf, bf):
    Bsz, Ssz = ids.shape
    x = emb[ids] * math.sqrt(D_MODEL) + pe[:Ssz]
    pad = (ids == 0)
    for p in layers:
        xn = _ln_ref(x, p["g1"], p["be1"])
        q = (xn @ p["wq"] + p["bq"]).reshape(Bsz, Ssz, N_HEADS, D_K).transpose(0, 2, 1, 3)
        k = (xn @ p["wk"] + p["bk"]).reshape(Bsz, Ssz, N_HEADS, D_K).transpose(0, 2, 1, 3)
        v = (xn @ p["wv"] + p["bv"]).reshape(Bsz, Ssz, N_HEADS, D_K).transpose(0, 2, 1, 3)
        score = jnp.einsum("bhqd,bhkd->bhqk", q, k) / math.sqrt(D_K)
        score = jnp.where(pad[:, None, None, :], -1e9, score)
        att = jax.nn.softmax(score, axis=-1)
        z = jnp.einsum("bhqk,bhkd->bhqd", att, v)
        z = z.transpose(0, 2, 1, 3).reshape(Bsz, Ssz, D_MODEL) @ p["wo"] + p["bo"]
        y = x + z
        yn = _ln_ref(y, p["g2"], p["be2"])
        f = jnp.maximum(yn @ p["w1"] + p["b1"], 0.0) @ p["w2"] + p["b2"]
        x = y + f
    return _ln_ref(x, gf, bf)


# ------------------------------- main ---------------------------------------------
if __name__ == "__main__":
    key = jax.random.PRNGKey(0)
    k_tok, k_param = jax.random.split(key)

    # token ids in [1, VOCAB) with trailing pad (0) tokens so the mask matters
    encoder_input = jax.random.randint(k_tok, (BATCH, SEQ), 1, VOCAB, dtype=jnp.int32)
    encoder_input = encoder_input.at[:, -2:].set(0)

    emb, layers, gf, bf = init_params(k_param)
    pe = positional_encoding(2000, D_MODEL)
    pe_seq = pe[:SEQ]                                         # (S, D)
    emb_scaled = emb * math.sqrt(D_MODEL)                     # fold sqrt(d_model)

    blk_bias, const, rt = build_static_constants()
    wslab, bslab = pack_params(layers, gf, bf)

    out = encoder_forward(encoder_input, emb_scaled, pe_seq, blk_bias,
                          const, rt, wslab, bslab)
    out = jax.block_until_ready(out)

    assert out.shape == (BATCH, SEQ, D_MODEL)
    assert bool(jnp.all(jnp.isfinite(out)))

    # numerical check vs. a pure-JAX reference of the PyTorch module
    ref = reference_forward(encoder_input, emb, pe, layers, gf, bf)
    max_err = float(jnp.max(jnp.abs(out - ref)))
    assert bool(jnp.allclose(out, ref, atol=3e-2, rtol=3e-2)), max_err

    print("KERNEL_OK")
</pallas_src>

<mosaic_0001>
module attributes {stable_mosaic.version = 11 : i64} {
  func.func @encoder_kernel(%arg0: memref<16x32xf32, #tpu.memory_space<vmem>>, %arg1: memref<64x64xf32, #tpu.memory_space<vmem>>, %arg2: memref<64x144xf32, #tpu.memory_space<vmem>>, %arg3: memref<16x64xf32, #tpu.memory_space<vmem>>, %arg4: memref<2x64x512xf32, #tpu.memory_space<vmem>>, %arg5: memref<3x8x128xf32, #tpu.memory_space<vmem>>, %arg6: memref<16x32xf32, #tpu.memory_space<vmem>>) attributes {dimension_semantics = [], scalar_prefetch = 0 : i64, scratch_operands = 0 : i64, tpu.core_type = #tpu.core_type<tc>} {
    %c0 = arith.constant 0 : index
    %c0_0 = arith.constant 0 : index
    %0 = vector.load %arg0[%c0, %c0_0] : memref<16x32xf32, #tpu.memory_space<vmem>>, vector<16x32xf32>
    %c0_1 = arith.constant 0 : index
    %c0_2 = arith.constant 0 : index
    %1 = vector.load %arg1[%c0_1, %c0_2] : memref<64x64xf32, #tpu.memory_space<vmem>>, vector<64x64xf32>
    %c0_3 = arith.constant 0 : index
    %c0_4 = arith.constant 0 : index
    %2 = vector.load %arg2[%c0_3, %c0_4] : memref<64x144xf32, #tpu.memory_space<vmem>>, vector<64x32xf32>
    %c0_5 = arith.constant 0 : index
    %c128 = arith.constant 128 : index
    %3 = vector.load %arg2[%c0_5, %c128] : memref<64x144xf32, #tpu.memory_space<vmem>>, vector<64x16xf32>
    %c0_6 = arith.constant 0 : index
    %c0_7 = arith.constant 0 : index
    %4 = vector.load %arg3[%c0_6, %c0_7] : memref<16x64xf32, #tpu.memory_space<vmem>>, vector<16x64xf32>
    %c0_8 = arith.constant 0 : index
    %c0_9 = arith.constant 0 : index
    %c0_10 = arith.constant 0 : index
    %5 = vector.load %arg4[%c0_8, %c0_9, %c0_10] : memref<2x64x512xf32, #tpu.memory_space<vmem>>, vector<1x32x96xf32>
    %6 = vector.shape_cast %5 : vector<1x32x96xf32> to vector<32x96xf32>
    %c0_11 = arith.constant 0 : index
    %c0_12 = arith.constant 0 : index
    %c128_13 = arith.constant 128 : index
    %7 = vector.load %arg4[%c0_11, %c0_12, %c128_13] : memref<2x64x512xf32, #tpu.memory_space<vmem>>, vector<1x32x32xf32>
    %8 = vector.shape_cast %7 : vector<1x32x32xf32> to vector<32x32xf32>
    %c0_14 = arith.constant 0 : index
    %c0_15 = arith.constant 0 : index
    %c256 = arith.constant 256 : index
    %9 = vector.load %arg4[%c0_14, %c0_15, %c256] : memref<2x64x512xf32, #tpu.memory_space<vmem>>, vector<1x32x64xf32>
    %10 = vector.shape_cast %9 : vector<1x32x64xf32> to vector<32x64xf32>
    %c0_16 = arith.constant 0 : index
    %c0_17 = arith.constant 0 : index
    %c384 = arith.constant 384 : index
    %11 = vector.load %arg4[%c0_16, %c0_17, %c384] : memref<2x64x512xf32, #tpu.memory_space<vmem>>, vector<1x64x32xf32>
    %12 = vector.shape_cast %11 : vector<1x64x32xf32> to vector<64x32xf32>
    %c0_18 = arith.constant 0 : index
    %c0_19 = arith.constant 0 : index
    %c0_20 = arith.constant 0 : index
    %13 = vector.load %arg5[%c0_18, %c0_19, %c0_20] : memref<3x8x128xf32, #tpu.memory_space<vmem>>, vector<1x1x96xf32>
    %14 = vector.shape_cast %13 : vector<1x1x96xf32> to vector<1x96xf32>
    %c0_21 = arith.constant 0 : index
    %c1 = arith.constant 1 : index
    %c0_22 = arith.constant 0 : index
    %15 = vector.load %arg5[%c0_21, %c1, %c0_22] : memref<3x8x128xf32, #tpu.memory_space<vmem>>, vector<1x1x32xf32>
    %16 = vector.shape_cast %15 : vector<1x1x32xf32> to vector<1x32xf32>
    %c0_23 = arith.constant 0 : index
    %c2 = arith.constant 2 : index
    %c0_24 = arith.constant 0 : index
    %17 = vector.load %arg5[%c0_23, %c2, %c0_24] : memref<3x8x128xf32, #tpu.memory_space<vmem>>, vector<1x1x64xf32>
    %18 = vector.shape_cast %17 : vector<1x1x64xf32> to vector<1x64xf32>
    %c0_25 = arith.constant 0 : index
    %c3 = arith.constant 3 : index
    %c0_26 = arith.constant 0 : index
    %19 = vector.load %arg5[%c0_25, %c3, %c0_26] : memref<3x8x128xf32, #tpu.memory_space<vmem>>, vector<1x1x32xf32>
    %20 = vector.shape_cast %19 : vector<1x1x32xf32> to vector<1x32xf32>
    %c0_27 = arith.constant 0 : index
    %c4 = arith.constant 4 : index
    %c0_28 = arith.constant 0 : index
    %21 = vector.load %arg5[%c0_27, %c4, %c0_28] : memref<3x8x128xf32, #tpu.memory_space<vmem>>, vector<1x1x32xf32>
    %22 = vector.shape_cast %21 : vector<1x1x32xf32> to vector<1x32xf32>
    %c0_29 = arith.constant 0 : index
    %c5 = arith.constant 5 : index
    %c0_30 = arith.constant 0 : index
    %23 = vector.load %arg5[%c0_29, %c5, %c0_30] : memref<3x8x128xf32, #tpu.memory_space<vmem>>, vector<1x1x32xf32>
    %24 = vector.shape_cast %23 : vector<1x1x32xf32> to vector<1x32xf32>
    %c0_31 = arith.constant 0 : index
    %c6 = arith.constant 6 : index
    %c0_32 = arith.constant 0 : index
    %25 = vector.load %arg5[%c0_31, %c6, %c0_32] : memref<3x8x128xf32, #tpu.memory_space<vmem>>, vector<1x1x32xf32>
    %26 = vector.shape_cast %25 : vector<1x1x32xf32> to vector<1x32xf32>
    %c0_33 = arith.constant 0 : index
    %c7 = arith.constant 7 : index
    %c0_34 = arith.constant 0 : index
    %27 = vector.load %arg5[%c0_33, %c7, %c0_34] : memref<3x8x128xf32, #tpu.memory_space<vmem>>, vector<1x1x32xf32>
    %28 = vector.shape_cast %27 : vector<1x1x32xf32> to vector<1x32xf32>
    %cst = arith.constant dense<0.000000e+00> : vector<16xf32>
    %29 = vector.multi_reduction <add>, %0, %cst [1] : vector<16x32xf32> to vector<16xf32>
    %30 = vector.shape_cast %29 : vector<16xf32> to vector<16x1xf32>
    %cst_35 = arith.constant 3.200000e+01 : f32
    %31 = vector.broadcast %cst_35 : f32 to vector<16x1xf32>
    %32 = arith.divf %30, %31 : vector<16x1xf32>
    %33 = vector.broadcast %32 : vector<16x1xf32> to vector<16x32xf32>
    %34 = arith.subf %0, %33 : vector<16x32xf32>
    %35 = arith.mulf %34, %34 : vector<16x32xf32>
    %cst_36 = arith.constant dense<0.000000e+00> : vector<16xf32>
    %36 = vector.multi_reduction <add>, %35, %cst_36 [1] : vector<16x32xf32> to vector<16xf32>
    %37 = vector.shape_cast %36 : vector<16xf32> to vector<16x1xf32>
    %cst_37 = arith.constant 3.200000e+01 : f32
    %38 = vector.broadcast %cst_37 : f32 to vector<16x1xf32>
    %39 = arith.divf %37, %38 : vector<16x1xf32>
    %40 = vector.broadcast %32 : vector<16x1xf32> to vector<16x32xf32>
    %41 = arith.subf %0, %40 : vector<16x32xf32>
    %cst_38 = arith.constant 9.99999974E-6 : f32
    %42 = vector.broadcast %cst_38 : f32 to vector<16x1xf32>
    %43 = arith.addf %39, %42 : vector<16x1xf32>
    %44 = math.rsqrt %43 : vector<16x1xf32>
    %45 = vector.broadcast %44 : vector<16x1xf32> to vector<16x32xf32>
    %46 = arith.mulf %41, %45 : vector<16x32xf32>
    %47 = vector.broadcast %22 : vector<1x32xf32> to vector<16x32xf32>
    %48 = arith.mulf %46, %47 : vector<16x32xf32>
    %49 = vector.broadcast %24 : vector<1x32xf32> to vector<16x32xf32>
    %50 = arith.addf %48, %49 : vector<16x32xf32>
    %cst_39 = arith.constant dense<0.000000e+00> : vector<16x96xf32>
    %51 = tpu.matmul %50, %6, %cst_39 {dimension_numbers = #tpu.dot_dimension_numbers<[1], [0], [0], [1], [0, 0, 1, 1], [], []>} : vector<16x32xf32>, vector<32x96xf32>, vector<16x96xf32> -> vector<16x96xf32>
    %52 = vector.broadcast %14 : vector<1x96xf32> to vector<16x96xf32>
    %53 = arith.addf %51, %52 : vector<16x96xf32>
    %cst_40 = arith.constant dense<0.000000e+00> : vector<64x96xf32>
    %54 = tpu.matmul %3, %53, %cst_40 {dimension_numbers = #tpu.dot_dimension_numbers<[1], [0], [0], [1], [0, 0, 1, 1], [], []>} : vector<64x16xf32>, vector<16x96xf32>, vector<64x96xf32> -> vector<64x96xf32>
    %55 = vector.extract_strided_slice %54 {offsets = [0, 0], sizes = [64, 32], strides = [1, 1]} : vector<64x96xf32> to vector<64x32xf32>
    %56 = arith.mulf %55, %2 : vector<64x32xf32>
    %57 = vector.extract_strided_slice %54 {offsets = [0, 32], sizes = [64, 32], strides = [1, 1]} : vector<64x96xf32> to vector<64x32xf32>
    %58 = vector.extract_strided_slice %54 {offsets = [0, 64], sizes = [64, 32], strides = [1, 1]} : vector<64x96xf32> to vector<64x32xf32>
    %cst_41 = arith.constant dense<0.000000e+00> : vector<64x64xf32>
    %59 = tpu.matmul %56, %57, %cst_41 {dimension_numbers = #tpu.dot_dimension_numbers<[1], [1], [0], [0], [0, 0, 1, 0], [], []>} : vector<64x32xf32>, vector<64x32xf32>, vector<64x64xf32> -> vector<64x64xf32>
    %60 = arith.addf %59, %1 : vector<64x64xf32>
    %cst_42 = arith.constant dense<0xFF800000> : vector<64xf32>
    %61 = vector.multi_reduction <maximumf>, %60, %cst_42 [1] : vector<64x64xf32> to vector<64xf32>
    %62 = vector.shape_cast %61 : vector<64xf32> to vector<64x1xf32>
    %63 = vector.broadcast %62 : vector<64x1xf32> to vector<64x64xf32>
    %64 = arith.subf %60, %63 : vector<64x64xf32>
    %65 = math.exp %64 : vector<64x64xf32>
    %cst_43 = arith.constant dense<0.000000e+00> : vector<64xf32>
    %66 = vector.multi_reduction <add>, %65, %cst_43 [1] : vector<64x64xf32> to vector<64xf32>
    %67 = vector.shape_cast %66 : vector<64xf32> to vector<64x1xf32>
    %68 = tpu.reciprocal %67 {approx = true} : vector<64x1xf32> -> vector<64x1xf32>
    %69 = vector.broadcast %68 : vector<64x1xf32> to vector<64x64xf32>
    %70 = arith.mulf %65, %69 : vector<64x64xf32>
    %cst_44 = arith.constant dense<0.000000e+00> : vector<64x32xf32>
    %71 = tpu.matmul %70, %58, %cst_44 {dimension_numbers = #tpu.dot_dimension_numbers<[1], [0], [0], [1], [0, 0, 1, 1], [], []>} : vector<64x64xf32>, vector<64x32xf32>, vector<64x32xf32> -> vector<64x32xf32>
    %72 = arith.mulf %71, %2 : vector<64x32xf32>
    %cst_45 = arith.constant dense<0.000000e+00> : vector<16x32xf32>
    %73 = tpu.matmul %4, %72, %cst_45 {dimension_numbers = #tpu.dot_dimension_numbers<[1], [0], [0], [1], [0, 0, 1, 1], [], []>} : vector<16x64xf32>, vector<64x32xf32>, vector<16x32xf32> -> vector<16x32xf32>
    %cst_46 = arith.constant dense<0.000000e+00> : vector<16x32xf32>
    %74 = tpu.matmul %73, %8, %cst_46 {dimension_numbers = #tpu.dot_dimension_numbers<[1], [0], [0], [1], [0, 0, 1, 1], [], []>} : vector<16x32xf32>, vector<32x32xf32>, vector<16x32xf32> -> vector<16x32xf32>
    %75 = vector.broadcast %16 : vector<1x32xf32> to vector<16x32xf32>
    %76 = arith.addf %74, %75 : vector<16x32xf32>
    %77 = arith.addf %0, %76 : vector<16x32xf32>
    %cst_47 = arith.constant dense<0.000000e+00> : vector<16xf32>
    %78 = vector.multi_reduction <add>, %77, %cst_47 [1] : vector<16x32xf32> to vector<16xf32>
    %79 = vector.shape_cast %78 : vector<16xf32> to vector<16x1xf32>
    %cst_48 = arith.constant 3.200000e+01 : f32
    %80 = vector.broadcast %cst_48 : f32 to vector<16x1xf32>
    %81 = arith.divf %79, %80 : vector<16x1xf32>
    %82 = vector.broadcast %81 : vector<16x1xf32> to vector<16x32xf32>
    %83 = arith.subf %77, %82 : vector<16x32xf32>
    %84 = arith.mulf %83, %83 : vector<16x32xf32>
    %cst_49 = arith.constant dense<0.000000e+00> : vector<16xf32>
    %85 = vector.multi_reduction <add>, %84, %cst_49 [1] : vector<16x32xf32> to vector<16xf32>
    %86 = vector.shape_cast %85 : vector<16xf32> to vector<16x1xf32>
    %cst_50 = arith.constant 3.200000e+01 : f32
    %87 = vector.broadcast %cst_50 : f32 to vector<16x1xf32>
    %88 = arith.divf %86, %87 : vector<16x1xf32>
    %89 = vector.broadcast %81 : vector<16x1xf32> to vector<16x32xf32>
    %90 = arith.subf %77, %89 : vector<16x32xf32>
    %cst_51 = arith.constant 9.99999974E-6 : f32
    %91 = vector.broadcast %cst_51 : f32 to vector<16x1xf32>
    %92 = arith.addf %88, %91 : vector<16x1xf32>
    %93 = math.rsqrt %92 : vector<16x1xf32>
    %94 = vector.broadcast %93 : vector<16x1xf32> to vector<16x32xf32>
    %95 = arith.mulf %90, %94 : vector<16x32xf32>
    %96 = vector.broadcast %26 : vector<1x32xf32> to vector<16x32xf32>
    %97 = arith.mulf %95, %96 : vector<16x32xf32>
    %98 = vector.broadcast %28 : vector<1x32xf32> to vector<16x32xf32>
    %99 = arith.addf %97, %98 : vector<16x32xf32>
    %cst_52 = arith.constant dense<0.000000e+00> : vector<16x64xf32>
    %100 = tpu.matmul %99, %10, %cst_52 {dimension_numbers = #tpu.dot_dimension_numbers<[1], [0], [0], [1], [0, 0, 1, 1], [], []>} : vector<16x32xf32>, vector<32x64xf32>, vector<16x64xf32> -> vector<16x64xf32>
    %101 = vector.broadcast %18 : vector<1x64xf32> to vector<16x64xf32>
    %102 = arith.addf %100, %101 : vector<16x64xf32>
    %cst_53 = arith.constant 0.000000e+00 : f32
    %103 = vector.broadcast %cst_53 : f32 to vector<16x64xf32>
    %104 = arith.maximumf %102, %103 : vector<16x64xf32>
    %cst_54 = arith.constant dense<0.000000e+00> : vector<16x32xf32>
    %105 = tpu.matmul %104, %12, %cst_54 {dimension_numbers = #tpu.dot_dimension_numbers<[1], [0], [0], [1], [0, 0, 1, 1], [], []>} : vector<16x64xf32>, vector<64x32xf32>, vector<16x32xf32> -> vector<16x32xf32>
    %106 = vector.broadcast %20 : vector<1x32xf32> to vector<16x32xf32>
    %107 = arith.addf %105, %106 : vector<16x32xf32>
    %108 = arith.addf %77, %107 : vector<16x32xf32>
    %c1_55 = arith.constant 1 : index
    %c0_56 = arith.constant 0 : index
    %c0_57 = arith.constant 0 : index
    %109 = vector.load %arg4[%c1_55, %c0_56, %c0_57] : memref<2x64x512xf32, #tpu.memory_space<vmem>>, vector<1x32x96xf32>
    %110 = vector.shape_cast %109 : vector<1x32x96xf32> to vector<32x96xf32>
    %c1_58 = arith.constant 1 : index
    %c0_59 = arith.constant 0 : index
    %c128_60 = arith.constant 128 : index
    %111 = vector.load %arg4[%c1_58, %c0_59, %c128_60] : memref<2x64x512xf32, #tpu.memory_space<vmem>>, vector<1x32x32xf32>
    %112 = vector.shape_cast %111 : vector<1x32x32xf32> to vector<32x32xf32>
    %c1_61 = arith.constant 1 : index
    %c0_62 = arith.constant 0 : index
    %c256_63 = arith.constant 256 : index
    %113 = vector.load %arg4[%c1_61, %c0_62, %c256_63] : memref<2x64x512xf32, #tpu.memory_space<vmem>>, vector<1x32x64xf32>
    %114 = vector.shape_cast %113 : vector<1x32x64xf32> to vector<32x64xf32>
    %c1_64 = arith.constant 1 : index
    %c0_65 = arith.constant 0 : index
    %c384_66 = arith.constant 384 : index
    %115 = vector.load %arg4[%c1_64, %c0_65, %c384_66] : memref<2x64x512xf32, #tpu.memory_space<vmem>>, vector<1x64x32xf32>
    %116 = vector.shape_cast %115 : vector<1x64x32xf32> to vector<64x32xf32>
    %c1_67 = arith.constant 1 : index
    %c0_68 = arith.constant 0 : index
    %c0_69 = arith.constant 0 : index
    %117 = vector.load %arg5[%c1_67, %c0_68, %c0_69] : memref<3x8x128xf32, #tpu.memory_space<vmem>>, vector<1x1x96xf32>
    %118 = vector.shape_cast %117 : vector<1x1x96xf32> to vector<1x96xf32>
    %c1_70 = arith.constant 1 : index
    %c1_71 = arith.constant 1 : index
    %c0_72 = arith.constant 0 : index
    %119 = vector.load %arg5[%c1_70, %c1_71, %c0_72] : memref<3x8x128xf32, #tpu.memory_space<vmem>>, vector<1x1x32xf32>
    %120 = vector.shape_cast %119 : vector<1x1x32xf32> to vector<1x32xf32>
    %c1_73 = arith.constant 1 : index
    %c2_74 = arith.constant 2 : index
    %c0_75 = arith.constant 0 : index
    %121 = vector.load %arg5[%c1_73, %c2_74, %c0_75] : memref<3x8x128xf32, #tpu.memory_space<vmem>>, vector<1x1x64xf32>
    %122 = vector.shape_cast %121 : vector<1x1x64xf32> to vector<1x64xf32>
    %c1_76 = arith.constant 1 : index
    %c3_77 = arith.constant 3 : index
    %c0_78 = arith.constant 0 : index
    %123 = vector.load %arg5[%c1_76, %c3_77, %c0_78] : memref<3x8x128xf32, #tpu.memory_space<vmem>>, vector<1x1x32xf32>
    %124 = vector.shape_cast %123 : vector<1x1x32xf32> to vector<1x32xf32>
    %c1_79 = arith.constant 1 : index
    %c4_80 = arith.constant 4 : index
    %c0_81 = arith.constant 0 : index
    %125 = vector.load %arg5[%c1_79, %c4_80, %c0_81] : memref<3x8x128xf32, #tpu.memory_space<vmem>>, vector<1x1x32xf32>
    %126 = vector.shape_cast %125 : vector<1x1x32xf32> to vector<1x32xf32>
    %c1_82 = arith.constant 1 : index
    %c5_83 = arith.constant 5 : index
    %c0_84 = arith.constant 0 : index
    %127 = vector.load %arg5[%c1_82, %c5_83, %c0_84] : memref<3x8x128xf32, #tpu.memory_space<vmem>>, vector<1x1x32xf32>
    %128 = vector.shape_cast %127 : vector<1x1x32xf32> to vector<1x32xf32>
    %c1_85 = arith.constant 1 : index
    %c6_86 = arith.constant 6 : index
    %c0_87 = arith.constant 0 : index
    %129 = vector.load %arg5[%c1_85, %c6_86, %c0_87] : memref<3x8x128xf32, #tpu.memory_space<vmem>>, vector<1x1x32xf32>
    %130 = vector.shape_cast %129 : vector<1x1x32xf32> to vector<1x32xf32>
    %c1_88 = arith.constant 1 : index
    %c7_89 = arith.constant 7 : index
    %c0_90 = arith.constant 0 : index
    %131 = vector.load %arg5[%c1_88, %c7_89, %c0_90] : memref<3x8x128xf32, #tpu.memory_space<vmem>>, vector<1x1x32xf32>
    %132 = vector.shape_cast %131 : vector<1x1x32xf32> to vector<1x32xf32>
    %cst_91 = arith.constant dense<0.000000e+00> : vector<16xf32>
    %133 = vector.multi_reduction <add>, %108, %cst_91 [1] : vector<16x32xf32> to vector<16xf32>
    %134 = vector.shape_cast %133 : vector<16xf32> to vector<16x1xf32>
    %cst_92 = arith.constant 3.200000e+01 : f32
    %135 = vector.broadcast %cst_92 : f32 to vector<16x1xf32>
    %136 = arith.divf %134, %135 : vector<16x1xf32>
    %137 = vector.broadcast %136 : vector<16x1xf32> to vector<16x32xf32>
    %138 = arith.subf %108, %137 : vector<16x32xf32>
    %139 = arith.mulf %138, %138 : vector<16x32xf32>
    %cst_93 = arith.constant dense<0.000000e+00> : vector<16xf32>
    %140 = vector.multi_reduction <add>, %139, %cst_93 [1] : vector<16x32xf32> to vector<16xf32>
    %141 = vector.shape_cast %140 : vector<16xf32> to vector<16x1xf32>
    %cst_94 = arith.constant 3.200000e+01 : f32
    %142 = vector.broadcast %cst_94 : f32 to vector<16x1xf32>
    %143 = arith.divf %141, %142 : vector<16x1xf32>
    %144 = vector.broadcast %136 : vector<16x1xf32> to vector<16x32xf32>
    %145 = arith.subf %108, %144 : vector<16x32xf32>
    %cst_95 = arith.constant 9.99999974E-6 : f32
    %146 = vector.broadcast %cst_95 : f32 to vector<16x1xf32>
    %147 = arith.addf %143, %146 : vector<16x1xf32>
    %148 = math.rsqrt %147 : vector<16x1xf32>
    %149 = vector.broadcast %148 : vector<16x1xf32> to vector<16x32xf32>
    %150 = arith.mulf %145, %149 : vector<16x32xf32>
    %151 = vector.broadcast %126 : vector<1x32xf32> to vector<16x32xf32>
    %152 = arith.mulf %150, %151 : vector<16x32xf32>
    %153 = vector.broadcast %128 : vector<1x32xf32> to vector<16x32xf32>
    %154 = arith.addf %152, %153 : vector<16x32xf32>
    %cst_96 = arith.constant dense<0.000000e+00> : vector<16x96xf32>
    %155 = tpu.matmul %154, %110, %cst_96 {dimension_numbers = #tpu.dot_dimension_numbers<[1], [0], [0], [1], [0, 0, 1, 1], [], []>} : vector<16x32xf32>, vector<32x96xf32>, vector<16x96xf32> -> vector<16x96xf32>
    %156 = vector.broadcast %118 : vector<1x96xf32> to vector<16x96xf32>
    %157 = arith.addf %155, %156 : vector<16x96xf32>
    %cst_97 = arith.constant dense<0.000000e+00> : vector<64x96xf32>
    %158 = tpu.matmul %3, %157, %cst_97 {dimension_numbers = #tpu.dot_dimension_numbers<[1], [0], [0], [1], [0, 0, 1, 1], [], []>} : vector<64x16xf32>, vector<16x96xf32>, vector<64x96xf32> -> vector<64x96xf32>
    %159 = vector.extract_strided_slice %158 {offsets = [0, 0], sizes = [64, 32], strides = [1, 1]} : vector<64x96xf32> to vector<64x32xf32>
    %160 = arith.mulf %159, %2 : vector<64x32xf32>
    %161 = vector.extract_strided_slice %158 {offsets = [0, 32], sizes = [64, 32], strides = [1, 1]} : vector<64x96xf32> to vector<64x32xf32>
    %162 = vector.extract_strided_slice %158 {offsets = [0, 64], sizes = [64, 32], strides = [1, 1]} : vector<64x96xf32> to vector<64x32xf32>
    %cst_98 = arith.constant dense<0.000000e+00> : vector<64x64xf32>
    %163 = tpu.matmul %160, %161, %cst_98 {dimension_numbers = #tpu.dot_dimension_numbers<[1], [1], [0], [0], [0, 0, 1, 0], [], []>} : vector<64x32xf32>, vector<64x32xf32>, vector<64x64xf32> -> vector<64x64xf32>
    %164 = arith.addf %163, %1 : vector<64x64xf32>
    %cst_99 = arith.constant dense<0xFF800000> : vector<64xf32>
    %165 = vector.multi_reduction <maximumf>, %164, %cst_99 [1] : vector<64x64xf32> to vector<64xf32>
    %166 = vector.shape_cast %165 : vector<64xf32> to vector<64x1xf32>
    %167 = vector.broadcast %166 : vector<64x1xf32> to vector<64x64xf32>
    %168 = arith.subf %164, %167 : vector<64x64xf32>
    %169 = math.exp %168 : vector<64x64xf32>
    %cst_100 = arith.constant dense<0.000000e+00> : vector<64xf32>
    %170 = vector.multi_reduction <add>, %169, %cst_100 [1] : vector<64x64xf32> to vector<64xf32>
    %171 = vector.shape_cast %170 : vector<64xf32> to vector<64x1xf32>
    %172 = tpu.reciprocal %171 {approx = true} : vector<64x1xf32> -> vector<64x1xf32>
    %173 = vector.broadcast %172 : vector<64x1xf32> to vector<64x64xf32>
    %174 = arith.mulf %169, %173 : vector<64x64xf32>
    %cst_101 = arith.constant dense<0.000000e+00> : vector<64x32xf32>
    %175 = tpu.matmul %174, %162, %cst_101 {dimension_numbers = #tpu.dot_dimension_numbers<[1], [0], [0], [1], [0, 0, 1, 1], [], []>} : vector<64x64xf32>, vector<64x32xf32>, vector<64x32xf32> -> vector<64x32xf32>
    %176 = arith.mulf %175, %2 : vector<64x32xf32>
    %cst_102 = arith.constant dense<0.000000e+00> : vector<16x32xf32>
    %177 = tpu.matmul %4, %176, %cst_102 {dimension_numbers = #tpu.dot_dimension_numbers<[1], [0], [0], [1], [0, 0, 1, 1], [], []>} : vector<16x64xf32>, vector<64x32xf32>, vector<16x32xf32> -> vector<16x32xf32>
    %cst_103 = arith.constant dense<0.000000e+00> : vector<16x32xf32>
    %178 = tpu.matmul %177, %112, %cst_103 {dimension_numbers = #tpu.dot_dimension_numbers<[1], [0], [0], [1], [0, 0, 1, 1], [], []>} : vector<16x32xf32>, vector<32x32xf32>, vector<16x32xf32> -> vector<16x32xf32>
    %179 = vector.broadcast %120 : vector<1x32xf32> to vector<16x32xf32>
    %180 = arith.addf %178, %179 : vector<16x32xf32>
    %181 = arith.addf %108, %180 : vector<16x32xf32>
    %cst_104 = arith.constant dense<0.000000e+00> : vector<16xf32>
    %182 = vector.multi_reduction <add>, %181, %cst_104 [1] : vector<16x32xf32> to vector<16xf32>
    %183 = vector.shape_cast %182 : vector<16xf32> to vector<16x1xf32>
    %cst_105 = arith.constant 3.200000e+01 : f32
    %184 = vector.broadcast %cst_105 : f32 to vector<16x1xf32>
    %185 = arith.divf %183, %184 : vector<16x1xf32>
    %186 = vector.broadcast %185 : vector<16x1xf32> to vector<16x32xf32>
    %187 = arith.subf %181, %186 : vector<16x32xf32>
    %188 = arith.mulf %187, %187 : vector<16x32xf32>
    %cst_106 = arith.constant dense<0.000000e+00> : vector<16xf32>
    %189 = vector.multi_reduction <add>, %188, %cst_106 [1] : vector<16x32xf32> to vector<16xf32>
    %190 = vector.shape_cast %189 : vector<16xf32> to vector<16x1xf32>
    %cst_107 = arith.constant 3.200000e+01 : f32
    %191 = vector.broadcast %cst_107 : f32 to vector<16x1xf32>
    %192 = arith.divf %190, %191 : vector<16x1xf32>
    %193 = vector.broadcast %185 : vector<16x1xf32> to vector<16x32xf32>
    %194 = arith.subf %181, %193 : vector<16x32xf32>
    %cst_108 = arith.constant 9.99999974E-6 : f32
    %195 = vector.broadcast %cst_108 : f32 to vector<16x1xf32>
    %196 = arith.addf %192, %195 : vector<16x1xf32>
    %197 = math.rsqrt %196 : vector<16x1xf32>
    %198 = vector.broadcast %197 : vector<16x1xf32> to vector<16x32xf32>
    %199 = arith.mulf %194, %198 : vector<16x32xf32>
    %200 = vector.broadcast %130 : vector<1x32xf32> to vector<16x32xf32>
    %201 = arith.mulf %199, %200 : vector<16x32xf32>
    %202 = vector.broadcast %132 : vector<1x32xf32> to vector<16x32xf32>
    %203 = arith.addf %201, %202 : vector<16x32xf32>
    %cst_109 = arith.constant dense<0.000000e+00> : vector<16x64xf32>
    %204 = tpu.matmul %203, %114, %cst_109 {dimension_numbers = #tpu.dot_dimension_numbers<[1], [0], [0], [1], [0, 0, 1, 1], [], []>} : vector<16x32xf32>, vector<32x64xf32>, vector<16x64xf32> -> vector<16x64xf32>
    %205 = vector.broadcast %122 : vector<1x64xf32> to vector<16x64xf32>
    %206 = arith.addf %204, %205 : vector<16x64xf32>
    %cst_110 = arith.constant 0.000000e+00 : f32
    %207 = vector.broadcast %cst_110 : f32 to vector<16x64xf32>
    %208 = arith.maximumf %206, %207 : vector<16x64xf32>
    %cst_111 = arith.constant dense<0.000000e+00> : vector<16x32xf32>
    %209 = tpu.matmul %208, %116, %cst_111 {dimension_numbers = #tpu.dot_dimension_numbers<[1], [0], [0], [1], [0, 0, 1, 1], [], []>} : vector<16x64xf32>, vector<64x32xf32>, vector<16x32xf32> -> vector<16x32xf32>
    %210 = vector.broadcast %124 : vector<1x32xf32> to vector<16x32xf32>
    %211 = arith.addf %209, %210 : vector<16x32xf32>
    %212 = arith.addf %181, %211 : vector<16x32xf32>
    %c2_112 = arith.constant 2 : index
    %c0_113 = arith.constant 0 : index
    %c0_114 = arith.constant 0 : index
    %213 = vector.load %arg5[%c2_112, %c0_113, %c0_114] : memref<3x8x128xf32, #tpu.memory_space<vmem>>, vector<1x1x32xf32>
    %214 = vector.shape_cast %213 : vector<1x1x32xf32> to vector<1x32xf32>
    %c2_115 = arith.constant 2 : index
    %c1_116 = arith.constant 1 : index
    %c0_117 = arith.constant 0 : index
    %215 = vector.load %arg5[%c2_115, %c1_116, %c0_117] : memref<3x8x128xf32, #tpu.memory_space<vmem>>, vector<1x1x32xf32>
    %216 = vector.shape_cast %215 : vector<1x1x32xf32> to vector<1x32xf32>
    %cst_118 = arith.constant dense<0.000000e+00> : vector<16xf32>
    %217 = vector.multi_reduction <add>, %212, %cst_118 [1] : vector<16x32xf32> to vector<16xf32>
    %218 = vector.shape_cast %217 : vector<16xf32> to vector<16x1xf32>
    %cst_119 = arith.constant 3.200000e+01 : f32
    %219 = vector.broadcast %cst_119 : f32 to vector<16x1xf32>
    %220 = arith.divf %218, %219 : vector<16x1xf32>
    %221 = vector.broadcast %220 : vector<16x1xf32> to vector<16x32xf32>
    %222 = arith.subf %212, %221 : vector<16x32xf32>
    %223 = arith.mulf %222, %222 : vector<16x32xf32>
    %cst_120 = arith.constant dense<0.000000e+00> : vector<16xf32>
    %224 = vector.multi_reduction <add>, %223, %cst_120 [1] : vector<16x32xf32> to vector<16xf32>
    %225 = vector.shape_cast %224 : vector<16xf32> to vector<16x1xf32>
    %cst_121 = arith.constant 3.200000e+01 : f32
    %226 = vector.broadcast %cst_121 : f32 to vector<16x1xf32>
    %227 = arith.divf %225, %226 : vector<16x1xf32>
    %228 = vector.broadcast %220 : vector<16x1xf32> to vector<16x32xf32>
    %229 = arith.subf %212, %228 : vector<16x32xf32>
    %cst_122 = arith.constant 9.99999974E-6 : f32
    %230 = vector.broadcast %cst_122 : f32 to vector<16x1xf32>
    %231 = arith.addf %227, %230 : vector<16x1xf32>
    %232 = math.rsqrt %231 : vector<16x1xf32>
    %233 = vector.broadcast %232 : vector<16x1xf32> to vector<16x32xf32>
    %234 = arith.mulf %229, %233 : vector<16x32xf32>
    %235 = vector.broadcast %214 : vector<1x32xf32> to vector<16x32xf32>
    %236 = arith.mulf %234, %235 : vector<16x32xf32>
    %237 = vector.broadcast %216 : vector<1x32xf32> to vector<16x32xf32>
    %238 = arith.addf %236, %237 : vector<16x32xf32>
    %c0_123 = arith.constant 0 : index
    %c0_124 = arith.constant 0 : index
    %239 = vector.load %arg6[%c0_123, %c0_124] : memref<16x32xf32, #tpu.memory_space<vmem>>, vector<16x32xf32>
    tpu.vector_store %arg6[%c0_123, %c0_124], %238 {strides = array<i32>} : memref<16x32xf32, #tpu.memory_space<vmem>>, vector<16x32xf32>,
    return
  }
}

</mosaic_0001>

<bundles_post_ra>
// kernel: encoder_forward.1
= control target key start
LH: loop header
LB: loop body
LE: loop exit
PB: predicated region body
PF: predicated region fallthrough
CT: control target
= control target key end

     0   :  { %11 = vsyncpa [#allocation3], 0  ;;  %s2442_s0 = inlined_call_operand.vmem [shape: f32[16,32], index: 0, kind: input, shape index: {}]   ;;  %s2443_s1 = inlined_call_operand.vmem [shape: f32[64,64], index: 1, kind: input, shape index: {}]   ;;  %s2444_s2 = inlined_call_operand.vmem [shape: f32[64,144], index: 2, kind: input, shape index: {}]   ;;  %s2445_s3 = inlined_call_operand.vmem [shape: f32[16,64], index: 3, kind: input, shape index: {}]   ;;  %s2446_s4 = inlined_call_operand.hbm [shape: f32[2,64,512], index: 4, kind: input, shape index: {}]   ;;  %s2447_s5 = inlined_call_operand.vmem [shape: f32[3,8,128], index: 5, kind: input, shape index: {}]   ;;  %s2448_s6 = inlined_call_operand.hbm [shape: f32[16,32], index: 6, kind: output, shape index: {}]  }
   0x1   :  { %12 = vsyncpa [#allocation4], 0  ;;  %s25_s23 = sshll.u32 %s2446_s4, 4  ;;  %s1731_s24 = smov [#allocation2]   ;;  %s26_s23 = int_to_ptr.hbm [resolvable:$true] %s25_s23 }
   0x2   :  { %s27_s25 = sshll.u32 %s1731_s24, 4  ;;  %s1732_s26 = smov 512   ;;  %s28_s25 = int_to_ptr.vmem [resolvable:$true] %s27_s25 }
   0x3   :  { %s1733_s27 = smov 32  }
   0x4   :  { %33 = dma.hbm_to_vmem [thread:$0]  %s26_s23, 8192, %s28_s25, [#allocation3], %s1732_s26, %s1732_s26, %s1733_s27  }
   0x5   :  { %1727 = dma.done.wait [#allocation3], 8192  }
   0x6   :  { %1728 = vsyncadd [#allocation3], 4294959104  ;;  %vm96_vm0 = vcmask 261120   ;;  %v1781_v0 = vld [vmem:[%s2442_s0] sm:$0xff]  ;;  %v1788_v2 = vld [vmem:[%s2442_s0 + $0x8] sm:$0xff]  ;;  %v1734_v4 = vmov 32.0  }
   0x7   :  { %v97_v1 = vsel %vm96_vm0, %v1781_v0, 0.0  ;;  %v100_v3 = vsel %vm96_vm0, %v1788_v2, 0.0  ;;  %1585 = vrcp.f32 %v1734_v4  ;;  %v71_v21 = vld [vmem:[#allocation2 + $0x60] sm:$0xff]  ;;  %v1816_v58 = vld [vmem:[%s2444_s2 + $0x8] sm:$0xff]  ;;  %vm184_vm8 = vcmask 130048   ;;  %v1823_v59 = vld [vmem:[%s2444_s2 + $0x18] sm:$0xff] }
   0x8   :  { %98 = vadd.xlane.f32.xlu0 %v97_v1  ;;  %173 = vmatpush.msra.mxu0 %v71_v21  ;;  %v70_v22 = vld [vmem:[#allocation2 + $0x40] sm:$0xff]  ;;  %v1830_v60 = vld [vmem:[%s2444_s2 + $0x28] sm:$0xff]  ;;  %v1837_v61 = vld [vmem:[%s2444_s2 + $0x38] sm:$0xff]  ;;  %s1735_s28 = smov 96   ;;  %vm363_vm9 = vcmask 523264   ;;  %s1736_s4 = smov 64  }
   0x9   :  { %v69_v23 = vld [vmem:[#allocation2 + $0x20] sm:$0xff]  ;;  %v1844_v62 = vld [vmem:[%s2444_s2 + $0x48] sm:$0xff]  ;;  %v1851_v63 = vld [vmem:[%s2444_s2 + $0x58] sm:$0xff]  ;;  %s1403_s8 = sshll.u32 %s2448_s6, 4  ;;  %s1739_s9 = smov 8   ;;  %s1404_s8 = int_to_ptr.hbm [resolvable:$true] %s1403_s8 }
   0xa   :  { %174 = vmatpush.msra.mxu0 %v70_v22  ;;  %v68_v24 = vld [vmem:[#allocation2] sm:$0xff]  ;;  %v1858_v1 = vld [vmem:[%s2444_s2 + $0x68] sm:$0xff] }
   0xb   :  { %v1567_v39 = vld [vmem:[%s2447_s5 + $0x4] ss:$0 sm:$0xff]  ;;  %v1568_v43 = vld [vmem:[%s2447_s5 + $0x5] ss:$0 sm:$0xff]  ;;  %v1569_v54 = vld [vmem:[%s2447_s5] ss:$0 sm:$0xff] }
   0xc   :  { %175 = vmatpush.msra.mxu0 %v69_v23  ;;  %v1915_v22 = vld [vmem:[%s2444_s2] sm:$0xff] }
   0xd   :  { %v1586_v5 = vpop.eup %1585 }
   0xe   :  { %v104_v6 = vmul.f32 32.0, %v1586_v5  ;;  %vm108_vm1 = vweird.f32 %v1586_v5  ;;  %176 = vmatpush.msra.mxu0 %v68_v24 }
  0x10   :  { %101 = vadd.xlane.f32.xlu0 %v100_v3  ;;  %v105_v7 = vsub.f32 1.0, %v104_v6  ;;  %v1865_v3 = vld [vmem:[%s2444_s2 + $0x78] sm:$0xff] }
  0x12   :  { %v106_v8 = vmul.f32 %v1586_v5, %v105_v7 }
  0x14   :  { %v107_v9 = vadd.f32 %v1586_v5, %v106_v8 }
  0x16   :  { %v1792_v10 = vsel %vm108_vm1, %v1586_v5, %v107_v9 }
  0x7b   :  { %v99_v11 = vpop.xlane.xlu0 %98 }
  0x7c   :  { %v110_v12 = vmul.f32 %v1792_v10, %v99_v11 }
  0x7e   :  { %v112_v13 = vsub.f32 %v1781_v0, %v110_v12 }
  0x80   :  { %v114_v14 = vmul.f32 %v112_v13, %v112_v13 }
  0x82   :  { %v116_v15 = vsel %vm96_vm0, %v114_v14, 0.0 }
  0x83   :  { %117 = vadd.xlane.f32.xlu1 %v116_v15  ;;  %v102_v16 = vpop.xlane.xlu0 %101 }
  0x84   :  { %v111_v17 = vmul.f32 %v1792_v10, %v102_v16 }
  0x86   :  { %v113_v18 = vsub.f32 %v1788_v2, %v111_v17 }
  0x88   :  { %v115_v19 = vmul.f32 %v113_v18, %v113_v18 }
  0x8a   :  { %v119_v20 = vsel %vm96_vm0, %v115_v19, 0.0 }
  0x8b   :  { %120 = vadd.xlane.f32.xlu1 %v119_v20 }
  0xf6   :  { %v118_v25 = vpop.xlane.xlu1 %117 }
  0xf7   :  { %v122_v26 = vmul.f32 %v118_v25, %v1792_v10  ;;  %v1924_v25 = vld [vmem:[%s2444_s2 + $0x10] sm:$0xff] }
  0xf9   :  { %v124_v27 = vadd.f32 1e-05, %v122_v26 }
  0xfb   :  { %1587 = vrsqrt.f32 %v124_v27  ;;  %vm132_vm3 = vweird.f32 %v124_v27 }
  0xfe   :  { %v121_v28 = vpop.xlane.xlu1 %120 }
  0xff   :  { %v123_v29 = vmul.f32 %v121_v28, %v1792_v10 }
 0x101   :  { %v1588_v30 = vpop.eup %1587  ;;  %v125_v31 = vadd.f32 1e-05, %v123_v29  ;;  %v1940_v29 = vld [vmem:[%s2444_s2 + $0x30] sm:$0xff] }
 0x102   :  { %v127_v32 = vmul.f32 %v1588_v30, %v124_v27  ;;  %vm133_vm2 = vweird.f32 %v1588_v30  ;;  %v1932_v27 = vld [vmem:[%s2444_s2 + $0x20] sm:$0xff] }
 0x103   :  { %1589 = vrsqrt.f32 %v125_v31  ;;  %vm134_vm4 = vmor %vm132_vm3, %vm133_vm2  ;;  %vm142_vm6 = vweird.f32 %v125_v31 }
 0x104   :  { %v128_v33 = vmul.f32 %v1588_v30, %v127_v32 }
 0x106   :  { %v129_v34 = vmul.f32 0.5, %v128_v33  ;;  %v1956_v33 = vld [vmem:[%s2444_s2 + $0x50] sm:$0xff] }
 0x108   :  { %v130_v35 = vsub.f32 1.5, %v129_v34 }
 0x109   :  { %v1590_v36 = vpop.eup %1589 }
 0x10a   :  { %v131_v37 = vmul.f32 %v1588_v30, %v130_v35  ;;  %v137_v38 = vmul.f32 %v1590_v36, %v125_v31  ;;  %vm143_vm5 = vweird.f32 %v1590_v36  ;;  %v1948_v31 = vld [vmem:[%s2444_s2 + $0x40] sm:$0xff] }
 0x10b   :  { %vm144_vm7 = vmor %vm142_vm6, %vm143_vm5  ;;  %v1964_v35 = vld [vmem:[%s2444_s2 + $0x60] sm:$0xff] }
 0x10c   :  { %v135_v40 = vsel %vm134_vm4, %v1588_v30, %v131_v37  ;;  %v138_v41 = vmul.f32 %v1590_v36, %v137_v38  ;;  %v1972_v37 = vld [vmem:[%s2444_s2 + $0x70] sm:$0xff] }
 0x10d   :  { %v146_v42 = vmul.f32 %v135_v40, %v112_v13 }
 0x10e   :  { %v139_v44 = vmul.f32 0.5, %v138_v41 }
 0x10f   :  { %v149_v45 = vmul.f32 %v1567_v39, %v146_v42 }
 0x110   :  { %v140_v46 = vsub.f32 1.5, %v139_v44 }
 0x111   :  { %v152_v47 = vadd.f32 %v1568_v43, %v149_v45 }
 0x112   :  { %v141_v48 = vmul.f32 %v1590_v36, %v140_v46 }
 0x113   :  { %1416 = vmatmul.msk.f32.vlgmr.msra.gmra.mxu0 %vm96_vm0, %v152_v47  ;;  %v1994_v47 = vld [vmem:[%s2443_s1 + $0x10] sm:$0xff] }
 0x114   :  { %v145_v49 = vsel %vm144_vm7, %v1590_v36, %v141_v48 }
 0x115   :  { %v147_v50 = vmul.f32 %v145_v49, %v113_v18 }
 0x117   :  { %v150_v51 = vmul.f32 %v1567_v39, %v147_v50  ;;  %v1980_v39 = vld [vmem:[%s2443_s1] sm:$0xff] }
 0x119   :  { %v153_v52 = vadd.f32 %v1568_v43, %v150_v51  ;;  %v1987_v43 = vld [vmem:[%s2443_s1 + $0x8] sm:$0xff]  ;;  %v2004_v51 = vld [vmem:[%s2443_s1 + $0x18] sm:$0xff] }
 0x11b   :  { %1417 = vmatmul.msk.f32.gmra.mxu0 %vm96_vm0, %v153_v52 }
 0x190   :  { %v178_v53 = vpop.f32.mrf.mxu0 }
 0x191   :  { %v179_v57 = vadd.f32 %v1569_v54, %v178_v53 }
 0x198   :  { %v181_v55 = vpop.f32.mrf.mxu0 }
 0x199   :  { %v182_v56 = vadd.f32 %v1569_v54, %v181_v55  ;;  %v2011_v55 = vld [vmem:[%s2443_s1 + $0x20] sm:$0xff] }
 0x19b   :  { %223 = vmatpush.msra.mxu1 %v182_v56 }
 0x19d   :  { %224 = vmatpush.msra.mxu1 %v179_v57 }
 0x19e   :  { %1418 = vmatmul.msk.f32.vlgmr.msra.gmra.mxu1 %vm184_vm8, %v1816_v58 }
 0x1a6   :  { %1419 = vmatmul.msk.f32.gmra.mxu1 %vm184_vm8, %v1823_v59 }
 0x1ae   :  { %1420 = vmatmul.msk.f32.gmra.mxu1 %vm184_vm8, %v1830_v60 }
 0x1b6   :  { %1421 = vmatmul.msk.f32.gmra.mxu1 %vm184_vm8, %v1837_v61 }
 0x1be   :  { %1422 = vmatmul.msk.f32.gmra.mxu1 %vm184_vm8, %v1844_v62 }
 0x1c6   :  { %1423 = vmatmul.msk.f32.gmra.mxu1 %vm184_vm8, %v1851_v63 }
 0x1ce   :  { %1424 = vmatmul.msk.f32.gmra.mxu1 %vm184_vm8, %v1858_v1 }
 0x1d6   :  { %1425 = vmatmul.msk.f32.gmra.mxu1 %vm184_vm8, %v1865_v3 }
 0x21b   :  { %v1869_v4 = vpop.f32.mrf.mxu1 }
 0x21c   :  { %v250_v24 = vmul.f32 %v1869_v4, %v1915_v22 }
 0x223   :  { %v1871_v5 = vpop.f32.mrf.mxu1 }
 0x224   :  { %v251_v26 = vmul.f32 %v1871_v5, %v1924_v25 }
 0x22b   :  { %v1873_v6 = vpop.f32.mrf.mxu1 }
 0x22c   :  { %v252_v28 = vmul.f32 %v1873_v6, %v1932_v27 }
 0x233   :  { %v1875_v7 = vpop.f32.mrf.mxu1 }
 0x234   :  { %v1537_v8 = vpack.i.bf16 %v1873_v6, %v1875_v7  ;;  %v253_v30 = vmul.f32 %v1875_v7, %v1940_v29 }
 0x23b   :  { %v1879_v9 = vpop.f32.mrf.mxu1 }
 0x23c   :  { %274 = vrot.lane.b32.xlu1 %v1879_v9, %s1735_s28  ;;  %v254_v32 = vmul.f32 %v1879_v9, %v1948_v31 }
 0x243   :  { %v1883_v11 = vpop.f32.mrf.mxu1 }
 0x244   :  { %v1532_v12 = vpack.i.bf16 %v1879_v9, %v1883_v11  ;;  %276 = vrot.lane.b32.xlu0 %v1883_v11, %s1735_s28  ;;  %v255_v34 = vmul.f32 %v1883_v11, %v1956_v33  ;;  %v2032_v9 = vld [vmem:[%s2443_s1 + $0x28] sm:$0xff] }
 0x24b   :  { %v1889_v13 = vpop.f32.mrf.mxu1 }
 0x24c   :  { %266 = vrot.lane.b32.xlu0 %v1869_v4, %s1735_s28  ;;  %278 = vrot.lane.b32.xlu2 %v1889_v13, %s1735_s28  ;;  %v256_v36 = vmul.f32 %v1889_v13, %v1964_v35 }
 0x253   :  { %v1895_v14 = vpop.f32.mrf.mxu1 }
 0x254   :  { %280 = vrot.lane.b32.xlu2 %v1895_v14, %s1735_s28  ;;  %v257_v38 = vmul.f32 %v1895_v14, %v1972_v37 }
 0x25c   :  { %272 = vrot.lane.b32.xlu2 %v1875_v7, %s1735_s28 }
 0x264   :  { %270 = vrot.lane.b32.xlu2 %v1873_v6, %s1735_s28 }
 0x26c   :  { %268 = vrot.lane.b32.xlu2 %v1871_v5, %s1735_s28 }
 0x2a6   :  { %v279_v15 = vpop.permute.xlu2 %278 }
 0x2ae   :  { %v281_v16 = vpop.permute.xlu2 %280  ;;  %v275_v19 = vpop.permute.xlu1 %274 }
 0x2af   :  { %1426 = vmatpush.xpose.msk.msra.mxu2 %vm96_vm0, %v281_v16 }
 0x2b3   :  { %1427 = vmatpush.xpose.msk.msra.mxu2 %vm96_vm0, %v279_v15 }
 0x2b6   :  { %v277_v17 = vpop.permute.xlu0 %276  ;;  %v273_v18 = vpop.permute.xlu2 %272 }
 0x2b7   :  { %1428 = vmatpush.xpose.msk.msra.mxu2 %vm96_vm0, %v277_v17  ;;  %v2022_v17 = vld [vmem:[%s2443_s1 + $0x30] sm:$0xff] }
 0x2bb   :  { %1429 = vmatpush.xpose.msk.msra.mxu2 %vm96_vm0, %v275_v19 }
 0x2be   :  { %v271_v20 = vpop.permute.xlu2 %270  ;;  %v267_v23 = vpop.permute.xlu0 %266 }
 0x2bf   :  { %1430 = vmatpush.xpose.msk.msra.mxu2 %vm96_vm0, %v273_v18 }
 0x2c3   :  { %1431 = vmatpush.xpose.msk.msra.mxu2 %vm96_vm0, %v271_v20  ;;  %v1527_v20 = vpack.i.bf16 %v1889_v13, %v1895_v14  ;;  %v2042_v13 = vld [vmem:[%s2443_s1 + $0x38] sm:$0xff] }
 0x2c6   :  { %v269_v21 = vpop.permute.xlu2 %268 }
 0x2c7   :  { %1432 = vmatpush.xpose.msk.msra.mxu2 %vm96_vm0, %v269_v21 }
 0x2cb   :  { %1433 = vmatpush.xpose.msk.msra.mxu2 %vm96_vm0, %v267_v23 }
 0x2ce   :  { %1434 = vmatmul.msk.f32.vlgmr.msra.gmra.mxu2 %vm96_vm0, %v250_v24 }
 0x2d6   :  { %1435 = vmatmul.msk.f32.gmra.mxu2 %vm96_vm0, %v251_v26  ;;  %v1542_v26 = vpack.i.bf16 %v1869_v4, %v1871_v5 }
 0x2de   :  { %1436 = vmatmul.msk.f32.gmra.mxu2 %vm96_vm0, %v252_v28 }
 0x2e6   :  { %1437 = vmatmul.msk.f32.gmra.mxu2 %vm96_vm0, %v253_v30 }
 0x2ee   :  { %1438 = vmatmul.msk.f32.gmra.mxu2 %vm96_vm0, %v254_v32 }
 0x2f6   :  { %1439 = vmatmul.msk.f32.gmra.mxu2 %vm96_vm0, %v255_v34 }
 0x2fe   :  { %1440 = vmatmul.msk.f32.gmra.mxu2 %vm96_vm0, %v256_v36 }
 0x306   :  { %1441 = vmatmul.msk.f32.gmra.mxu2 %vm96_vm0, %v257_v38 }
 0x351   :  { %v339_v40 = vpop.f32.mrf.mxu2 }
 0x352   :  { %v340_v41 = vadd.f32 %v339_v40, %v1980_v39 }
 0x354   :  { %v364_v42 = vsel %vm363_vm9, %v340_v41, -inf }
 0x355   :  { %365 = vmax.xlane.f32.xlu2 %v364_v42 }
 0x359   :  { %v342_v44 = vpop.f32.mrf.mxu2 }
 0x35a   :  { %v343_v45 = vadd.f32 %v342_v44, %v1987_v43 }
 0x35c   :  { %v367_v46 = vsel %vm363_vm9, %v343_v45, -inf }
 0x35d   :  { %368 = vmax.xlane.f32.xlu1 %v367_v46 }
 0x361   :  { %v345_v48 = vpop.f32.mrf.mxu2 }
 0x362   :  { %v1997_v49 = vadd.f32 %v345_v48, %v1994_v47 }
 0x364   :  { %v370_v50 = vsel %vm363_vm9, %v1997_v49, -inf }
 0x365   :  { %371 = vmax.xlane.f32.xlu0 %v370_v50 }
 0x369   :  { %v348_v52 = vpop.f32.mrf.mxu2 }
 0x36a   :  { %v349_v53 = vadd.f32 %v348_v52, %v2004_v51 }
 0x36c   :  { %v373_v54 = vsel %vm363_vm9, %v349_v53, -inf }
 0x36d   :  { %374 = vmax.xlane.f32.xlu2 %v373_v54 }
 0x371   :  { %v351_v56 = vpop.f32.mrf.mxu2 }
 0x372   :  { %v352_v57 = vadd.f32 %v351_v56, %v2011_v55 }
 0x374   :  { %v376_v15 = vsel %vm363_vm9, %v352_v57, -inf }
 0x375   :  { %377 = vmax.xlane.f32.xlu1 %v376_v15 }
 0x379   :  { %v354_v16 = vpop.f32.mrf.mxu2  ;;  %1533 = vrot.lane.b32.xlu0 %v1532_v12, %s1736_s4 }
 0x37a   :  { %v2035_v11 = vadd.f32 %v354_v16, %v2032_v9 }
 0x37c   :  { %v379_v12 = vsel %vm363_vm9, %v2035_v11, -inf }
 0x381   :  { %v357_v18 = vpop.f32.mrf.mxu2 }
 0x382   :  { %v358_v19 = vadd.f32 %v357_v18, %v2022_v17 }
 0x384   :  { %v382_v21 = vsel %vm363_vm9, %v358_v19, -inf }
 0x385   :  { %383 = vmax.xlane.f32.xlu1 %v382_v21  ;;  %1528 = vrot.lane.b32.xlu2 %v1527_v20, %s1736_s4 }
 0x389   :  { %v360_v14 = vpop.f32.mrf.mxu2 }
 0x38a   :  { %v2045_v23 = vadd.f32 %v360_v14, %v2042_v13 }
 0x38c   :  { %v385_v24 = vsel %vm363_vm9, %v2045_v23, -inf }
 0x3a3   :  { %380 = vmax.xlane.f32.xlu0 %v379_v12 }
 0x3ae   :  { %386 = vmax.xlane.f32.xlu2 %v385_v24 }
 0x3b7   :  { %1543 = vrot.lane.b32.xlu0 %v1542_v26, %s1736_s4 }
 0x3c8   :  { %v366_v28 = vpop.xlane.xlu2 %365 }
 0x3c9   :  { %v388_v30 = vsub.f32 %v340_v41, %v366_v28 }
 0x3cb   :  { %v396_v32 = vmul.f32 1.442695, %v388_v30 }
 0x3cd   :  { %1591 = vpow2.f32 %v396_v32 }
 0x3d0   :  { %v369_v34 = vpop.xlane.xlu1 %368 }
 0x3d1   :  { %v389_v36 = vsub.f32 %v343_v45, %v369_v34 }
 0x3d3   :  { %v2052_v38 = vpop.eup %1591  ;;  %v398_v40 = vmul.f32 1.442695, %v389_v36 }
 0x3d4   :  { %v412_v42 = vsel %vm363_vm9, %v2052_v38, 0.0 }
 0x3d5   :  { %413 = vadd.xlane.f32.xlu1 %v412_v42  ;;  %1593 = vpow2.f32 %v398_v40 }
 0x3d8   :  { %v372_v41 = vpop.xlane.xlu0 %371 }
 0x3d9   :  { %v390_v6 = vsub.f32 %v1997_v49, %v372_v41 }
 0x3db   :  { %v2056_v44 = vpop.eup %1593  ;;  %v400_v7 = vmul.f32 1.442695, %v390_v6 }
 0x3dc   :  { %v415_v4 = vsel %vm363_vm9, %v2056_v44, 0.0 }
 0x3e0   :  { %v375_v46 = vpop.xlane.xlu2 %374 }
 0x3e1   :  { %v391_v5 = vsub.f32 %v349_v53, %v375_v46  ;;  %416 = vadd.xlane.f32.xlu0 %v415_v4 }
 0x3e3   :  { %v402_v48 = vmul.f32 1.442695, %v391_v5 }
 0x3e5   :  { %1595 = vpow2.f32 %v402_v48 }
 0x3e8   :  { %v378_v45 = vpop.xlane.xlu1 %377  ;;  %v1529_v50 = vpop.permute.xlu2 %1528 }
 0x3e9   :  { %v392_v52 = vsub.f32 %v352_v57, %v378_v45  ;;  %v1530_v54 = vunpack.i.l.bf16 %v1529_v50  ;;  %v1531_v18 = vunpack.i.h.bf16 %v1529_v50 }
 0x3eb   :  { %v2060_v56 = vpop.eup %1595  ;;  %v404_v15 = vmul.f32 1.442695, %v392_v52  ;;  %v1534_v16 = vpop.permute.xlu0 %1533  ;;  %508 = vmatpush.msra.mxu3 %v1530_v54 }
 0x3ec   :  { %v421_v20 = vsel %vm363_vm9, %v2060_v56, 0.0  ;;  %v1535_v21 = vunpack.i.l.bf16 %v1534_v16  ;;  %v1536_v53 = vunpack.i.h.bf16 %v1534_v16 }
 0x3ed   :  { %1597 = vpow2.f32 %v404_v15  ;;  %509 = vmatpush.msra.mxu3 %v1531_v18  ;;  %422 = vadd.xlane.f32.xlu2 %v421_v20 }
 0x3ee   :  { %1538 = vrot.lane.b32.xlu1 %v1537_v8, %s1736_s4 }
 0x3ef   :  { %510 = vmatpush.msra.mxu3 %v1535_v21 }
 0x3f1   :  { %511 = vmatpush.msra.mxu3 %v1536_v53 }
 0x3f3   :  { %v2068_v57 = vpop.eup %1597 }
 0x3f4   :  { %v424_v12 = vsel %vm363_vm9, %v2068_v57, 0.0 }
 0x3f5   :  { %425 = vadd.xlane.f32.xlu2 %v424_v12 }
 0x3f8   :  { %v384_v14 = vpop.xlane.xlu1 %383 }
 0x3f9   :  { %v394_v24 = vsub.f32 %v358_v19, %v384_v14 }
 0x3fb   :  { %v408_v26 = vmul.f32 1.442695, %v394_v24 }
 0x3fd   :  { %1599 = vpow2.f32 %v408_v26 }
 0x3fe   :  { %1601 = vpow2.f32 %v400_v7 }
 0x403   :  { %v2072_v28 = vpop.eup %1599 }
 0x404   :  { %v430_v30 = vsel %vm363_vm9, %v2072_v28, 0.0  ;;  %v1602_v8 = vpop.eup %1601 }
 0x405   :  { %431 = vadd.xlane.f32.xlu2 %v430_v30  ;;  %v418_v36 = vsel %vm363_vm9, %v1602_v8, 0.0 }
 0x416   :  { %v381_v32 = vpop.xlane.xlu0 %380 }
 0x417   :  { %v393_v34 = vsub.f32 %v2035_v11, %v381_v32 }
 0x418   :  { %419 = vadd.xlane.f32.xlu1 %v418_v36 }
 0x419   :  { %v406_v19 = vmul.f32 1.442695, %v393_v34 }
 0x41b   :  { %1603 = vpow2.f32 %v406_v19 }
 0x421   :  { %v1604_v40 = vpop.eup %1603  ;;  %v387_v42 = vpop.xlane.xlu2 %386 }
 0x422   :  { %v395_v46 = vsub.f32 %v2045_v23, %v387_v42  ;;  %v427_v4 = vsel %vm363_vm9, %v1604_v40, 0.0 }
 0x423   :  { %428 = vadd.xlane.f32.xlu0 %v427_v4 }
 0x424   :  { %v410_v5 = vmul.f32 1.442695, %v395_v46 }
 0x426   :  { %1605 = vpow2.f32 %v410_v5 }
 0x429   :  { %v1544_v11 = vpop.permute.xlu0 %1543 }
 0x42a   :  { %v1545_v23 = vunpack.i.l.bf16 %v1544_v11  ;;  %v1546_v16 = vunpack.i.h.bf16 %v1544_v11 }
 0x42c   :  { %v1606_v49 = vpop.eup %1605 }
 0x42d   :  { %v433_v41 = vsel %vm363_vm9, %v1606_v49, 0.0 }
 0x42e   :  { %434 = vadd.xlane.f32.xlu0 %v433_v41 }
 0x448   :  { %v414_v48 = vpop.xlane.xlu1 %413 }
 0x449   :  { %1607 = vrcp.f32 %v414_v48 }
 0x44f   :  { %v1608_v15 = vpop.eup %1607 }
 0x450   :  { %v444_v18 = vmul.f32 %v1608_v15, %v2052_v38 }
 0x454   :  { %v417_v54 = vpop.xlane.xlu0 %416 }
 0x455   :  { %1609 = vrcp.f32 %v417_v54 }
 0x45b   :  { %v1610_v20 = vpop.eup %1609 }
 0x45c   :  { %v445_v21 = vmul.f32 %v1610_v20, %v2056_v44  ;;  %v75_v20 = vld [vmem:[#allocation2 + $0x68] sm:$0xff] }
 0x460   :  { %v1539_v45 = vpop.permute.xlu1 %1538  ;;  %v423_v12 = vpop.xlane.xlu2 %422 }
 0x461   :  { %v1540_v50 = vunpack.i.l.bf16 %v1539_v45  ;;  %v1541_v52 = vunpack.i.h.bf16 %v1539_v45 }
 0x463   :  { %512 = vmatpush.msra.mxu3 %v1540_v50 }
 0x465   :  { %513 = vmatpush.msra.mxu3 %v1541_v52 }
 0x467   :  { %514 = vmatpush.msra.mxu3 %v1545_v23 }
 0x468   :  { %v426_v26 = vpop.xlane.xlu2 %425 }
 0x469   :  { %515 = vmatpush.msra.mxu3 %v1546_v16 }
 0x46a   :  { %1442 = vmatmul.msk.f32.vlgmr.msra.gmra.mxu3 %vm363_vm9, %v444_v18  ;;  %v2106_v18 = vld [vmem:[%s2445_s3] sm:$0xff] }
 0x472   :  { %1443 = vmatmul.msk.f32.gmra.mxu3 %vm363_vm9, %v445_v21  ;;  %v74_v21 = vld [vmem:[#allocation2 + $0x48] sm:$0xff] }
 0x478   :  { %v432_v32 = vpop.xlane.xlu2 %431 }
 0x48b   :  { %v420_v53 = vpop.xlane.xlu1 %419 }
 0x48c   :  { %1611 = vrcp.f32 %v420_v53  ;;  %v73_v53 = vld [vmem:[#allocation2 + $0x28] sm:$0xff] }
 0x48d   :  { %1613 = vrcp.f32 %v423_v12  ;;  %v2113_v12 = vld [vmem:[%s2445_s3 + $0x8] sm:$0xff] }
 0x48e   :  { %1615 = vrcp.f32 %v426_v26 }
 0x492   :  { %v1612_v14 = vpop.eup %1611 }
 0x493   :  { %v446_v24 = vmul.f32 %v1612_v14, %v1602_v8  ;;  %v1614_v30 = vpop.eup %1613  ;;  %v72_v14 = vld [vmem:[#allocation2 + $0x8] sm:$0xff] }
 0x494   :  { %v447_v38 = vmul.f32 %v1614_v30, %v2060_v56  ;;  %v1616_v7 = vpop.eup %1615  ;;  %v1570_v30 = vld [vmem:[%s2447_s5 + $0x1] ss:$0 sm:$0xff] }
 0x495   :  { %1444 = vmatmul.msk.f32.gmra.mxu3 %vm363_vm9, %v446_v24  ;;  %v448_v44 = vmul.f32 %v1616_v7, %v2068_v57 }
 0x496   :  { %v429_v6 = vpop.xlane.xlu0 %428 }
 0x497   :  { %1617 = vrcp.f32 %v429_v6 }
 0x498   :  { %1619 = vrcp.f32 %v432_v32 }
 0x49d   :  { %1445 = vmatmul.msk.f32.gmra.mxu3 %vm363_vm9, %v447_v38  ;;  %v1618_v34 = vpop.eup %1617 }
 0x49e   :  { %v449_v8 = vmul.f32 %v1618_v34, %v1604_v40  ;;  %v1620_v19 = vpop.eup %1619 }
 0x49f   :  { %v450_v56 = vmul.f32 %v1620_v19, %v2072_v28 }
 0x4a1   :  { %v435_v36 = vpop.xlane.xlu0 %434 }
 0x4a2   :  { %1621 = vrcp.f32 %v435_v36 }
 0x4a5   :  { %1446 = vmatmul.msk.f32.gmra.mxu3 %vm363_vm9, %v448_v44 }
 0x4a8   :  { %v1622_v42 = vpop.eup %1621 }
 0x4a9   :  { %v451_v46 = vmul.f32 %v1622_v42, %v1606_v49 }
 0x4ad   :  { %1447 = vmatmul.msk.f32.gmra.mxu3 %vm363_vm9, %v449_v8 }
 0x4b5   :  { %1448 = vmatmul.msk.f32.gmra.mxu3 %vm363_vm9, %v450_v56 }
 0x4bd   :  { %1449 = vmatmul.msk.f32.gmra.mxu3 %vm363_vm9, %v451_v46 }
 0x4ed   :  { %v517_v57 = vpop.f32.mrf.mxu3 }
 0x4ee   :  { %v541_v16 = vmul.f32 %v517_v57, %v1915_v22 }
 0x4f5   :  { %v520_v4 = vpop.f32.mrf.mxu3 }
 0x4f6   :  { %v542_v23 = vmul.f32 %v520_v4, %v1924_v25 }
 0x518   :  { %v523_v5 = vpop.f32.mrf.mxu3 }
 0x519   :  { %v543_v15 = vmul.f32 %v523_v5, %v1932_v27 }
 0x520   :  { %v526_v41 = vpop.f32.mrf.mxu3 }
 0x521   :  { %v544_v54 = vmul.f32 %v526_v41, %v1940_v29 }
 0x528   :  { %v529_v48 = vpop.f32.mrf.mxu3 }
 0x529   :  { %v545_v49 = vmul.f32 %v529_v48, %v1948_v31  ;;  %v79_v48 = vld [vmem:[#allocation2 + $0x70] sm:$0xff] }
 0x530   :  { %v532_v11 = vpop.f32.mrf.mxu3 }
 0x531   :  { %v546_v28 = vmul.f32 %v532_v11, %v1956_v33  ;;  %v78_v11 = vld [vmem:[#allocation2 + $0x50] sm:$0xff] }
 0x538   :  { %v535_v40 = vpop.f32.mrf.mxu3 }
 0x539   :  { %v547_v52 = vmul.f32 %v535_v40, %v1964_v35  ;;  %v77_v40 = vld [vmem:[#allocation2 + $0x30] sm:$0xff] }
 0x540   :  { %v538_v45 = vpop.f32.mrf.mxu3 }
 0x541   :  { %v548_v50 = vmul.f32 %v538_v45, %v1972_v37  ;;  %v76_v45 = vld [vmem:[#allocation2 + $0x10] sm:$0xff] }
 0x543   :  { %563 = vmatpush.msrb.mxu0 %v548_v50 }
 0x545   :  { %564 = vmatpush.msrb.mxu0 %v547_v52 }
 0x547   :  { %565 = vmatpush.msrb.mxu0 %v546_v28 }
 0x549   :  { %566 = vmatpush.msrb.mxu0 %v545_v49  ;;  %v87_v49 = vld [vmem:[#allocation2 + $0xf8] sm:$0xff] }
 0x54a   :  { %707 = vmatpush.msrb.mxu1 %v87_v49 }
 0x54b   :  { %567 = vmatpush.msrb.mxu0 %v544_v54  ;;  %v86_v54 = vld [vmem:[#allocation2 + $0xd8] sm:$0xff] }
 0x54c   :  { %708 = vmatpush.msrb.mxu1 %v86_v54 }
 0x54d   :  { %568 = vmatpush.msrb.mxu0 %v543_v15  ;;  %v85_v15 = vld [vmem:[#allocation2 + $0xb8] sm:$0xff] }
 0x54e   :  { %709 = vmatpush.msrb.mxu1 %v85_v15 }
 0x54f   :  { %569 = vmatpush.msrb.mxu0 %v542_v23 }
 0x551   :  { %570 = vmatpush.msrb.mxu0 %v541_v16 }
 0x552   :  { %1450 = vmatmul.msk.f32.vlgmr.msrb.gmra.mxu0 %vm363_vm9, %v2106_v18 }
 0x553   :  { %597 = vmatpush.msra.mxu0 %v75_v20  ;;  %v84_v20 = vld [vmem:[#allocation2 + $0x98] sm:$0xff] }
 0x554   :  { %710 = vmatpush.msrb.mxu1 %v84_v20  ;;  %v1574_v20 = vld [vmem:[%s2447_s5 + $0x3] ss:$0 sm:$0xff] }
 0x555   :  { %598 = vmatpush.msra.mxu0 %v74_v21 }
 0x557   :  { %599 = vmatpush.msra.mxu0 %v73_v53 }
 0x559   :  { %600 = vmatpush.msra.mxu0 %v72_v14  ;;  %v83_v14 = vld [vmem:[#allocation2 + $0x78] sm:$0xff] }
 0x55a   :  { %1451 = vmatmul.msk.f32.gmra.mxu0 %vm363_vm9, %v2113_v12  ;;  %711 = vmatpush.msrb.mxu1 %v83_v14 }
 0x55b   :  { %679 = vmatpush.msrb.mxu0 %v79_v48 }
 0x55d   :  { %680 = vmatpush.msrb.mxu0 %v78_v11 }
 0x55f   :  { %681 = vmatpush.msrb.mxu0 %v77_v40 }
 0x561   :  { %682 = vmatpush.msrb.mxu0 %v76_v45 }
 0x5cf   :  { %v572_v24 = vpop.f32.mrf.mxu0 }
 0x5d0   :  { %1452 = vmatmul.msk.f32.vlgmr.msra.gmra.mxu0 %vm96_vm0, %v572_v24 }
 0x5d7   :  { %v575_v26 = vpop.f32.mrf.mxu0 }
 0x5d8   :  { %1453 = vmatmul.msk.f32.gmra.mxu0 %vm96_vm0, %v575_v26 }
 0x64d   :  { %v602_v38 = vpop.f32.mrf.mxu0 }
 0x64e   :  { %v603_v6 = vadd.f32 %v1570_v30, %v602_v38 }
 0x650   :  { %v2123_v7 = vadd.f32 %v603_v6, %v1781_v0 }
 0x652   :  { %v610_v44 = vsel %vm96_vm0, %v2123_v7, 0.0 }
 0x653   :  { %611 = vadd.xlane.f32.xlu1 %v610_v44 }
 0x655   :  { %v605_v32 = vpop.f32.mrf.mxu0 }
 0x656   :  { %v606_v34 = vadd.f32 %v1570_v30, %v605_v32 }
 0x658   :  { %v2128_v8 = vadd.f32 %v606_v34, %v1788_v2  ;;  %v1571_v34 = vld [vmem:[%s2447_s5 + $0x6] ss:$0 sm:$0xff] }
 0x65a   :  { %v613_v36 = vsel %vm96_vm0, %v2128_v8, 0.0 }
 0x65b   :  { %614 = vadd.xlane.f32.xlu2 %v613_v36 }
 0x6c6   :  { %v612_v19 = vpop.xlane.xlu1 %611 }
 0x6c7   :  { %v616_v56 = vmul.f32 %v612_v19, %v1792_v10 }
 0x6c9   :  { %v618_v42 = vsub.f32 %v2123_v7, %v616_v56 }
 0x6cb   :  { %v620_v0 = vmul.f32 %v618_v42, %v618_v42 }
 0x6cd   :  { %v622_v46 = vsel %vm96_vm0, %v620_v0, 0.0  ;;  %v1572_v0 = vld [vmem:[%s2447_s5 + $0x7] ss:$0 sm:$0xff] }
 0x6ce   :  { %v615_v57 = vpop.xlane.xlu2 %614  ;;  %623 = vadd.xlane.f32.xlu0 %v622_v46 }
 0x6cf   :  { %v617_v4 = vmul.f32 %v615_v57, %v1792_v10 }
 0x6d1   :  { %v619_v5 = vsub.f32 %v2128_v8, %v617_v4 }
 0x6d3   :  { %v621_v2 = vmul.f32 %v619_v5, %v619_v5 }
 0x6d5   :  { %v625_v41 = vsel %vm96_vm0, %v621_v2, 0.0 }
 0x6d6   :  { %626 = vadd.xlane.f32.xlu1 %v625_v41 }
 0x741   :  { %v624_v50 = vpop.xlane.xlu0 %623 }
 0x742   :  { %v628_v52 = vmul.f32 %v624_v50, %v1792_v10  ;;  %v81_v50 = vld [vmem:[#allocation2 + $0x38] sm:$0xff] }
 0x744   :  { %v630_v28 = vadd.f32 1e-05, %v628_v52  ;;  %v80_v52 = vld [vmem:[#allocation2 + $0x18] sm:$0xff] }
 0x746   :  { %1623 = vrsqrt.f32 %v630_v28  ;;  %vm638_vm11 = vweird.f32 %v630_v28 }
 0x749   :  { %v627_v23 = vpop.xlane.xlu1 %626 }
 0x74a   :  { %v629_v16 = vmul.f32 %v627_v23, %v1792_v10 }
 0x74c   :  { %v1624_v21 = vpop.eup %1623  ;;  %v631_v53 = vadd.f32 1e-05, %v629_v16 }
 0x74d   :  { %v633_v24 = vmul.f32 %v1624_v21, %v630_v28  ;;  %vm639_vm10 = vweird.f32 %v1624_v21  ;;  %v1573_v28 = vld [vmem:[%s2447_s5 + $0x2] ss:$0 sm:$0xff] }
 0x74e   :  { %1625 = vrsqrt.f32 %v631_v53  ;;  %vm640_vm12 = vmor %vm638_vm11, %vm639_vm10  ;;  %vm648_vm14 = vweird.f32 %v631_v53 }
 0x74f   :  { %v634_v26 = vmul.f32 %v1624_v21, %v633_v24 }
 0x751   :  { %v635_v30 = vmul.f32 0.5, %v634_v26 }
 0x753   :  { %v636_v38 = vsub.f32 1.5, %v635_v30 }
 0x754   :  { %v1626_v6 = vpop.eup %1625 }
 0x755   :  { %v637_v44 = vmul.f32 %v1624_v21, %v636_v38  ;;  %v643_v32 = vmul.f32 %v1626_v6, %v631_v53  ;;  %vm649_vm13 = vweird.f32 %v1626_v6 }
 0x756   :  { %vm650_vm15 = vmor %vm648_vm14, %vm649_vm13 }
 0x757   :  { %v641_v36 = vsel %vm640_vm12, %v1624_v21, %v637_v44  ;;  %v644_v19 = vmul.f32 %v1626_v6, %v643_v32 }
 0x758   :  { %v652_v56 = vmul.f32 %v641_v36, %v618_v42  ;;  %v82_v42 = vld [vmem:[#allocation2 + $0x58] sm:$0xff] }
 0x759   :  { %v645_v46 = vmul.f32 0.5, %v644_v19  ;;  %712 = vmatpush.msrb.mxu1 %v82_v42 }
 0x75a   :  { %v655_v57 = vmul.f32 %v1571_v34, %v652_v56 }
 0x75b   :  { %v646_v4 = vsub.f32 1.5, %v645_v46  ;;  %713 = vmatpush.msrb.mxu1 %v81_v50 }
 0x75c   :  { %v658_v2 = vadd.f32 %v1572_v0, %v655_v57  ;;  %v728_v57 = vld [vmem:[#allocation2 + $0x160] sm:$0xff] }
 0x75d   :  { %v647_v41 = vmul.f32 %v1626_v6, %v646_v4  ;;  %714 = vmatpush.msrb.mxu1 %v80_v52  ;;  %823 = vmatpush.msra.mxu0 %v728_v57  ;;  %v727_v4 = vld [vmem:[#allocation2 + $0x140] sm:$0xff] }
 0x75e   :  { %1454 = vmatmul.msk.f32.vlgmr.msrb.gmra.mxu0 %vm96_vm0, %v658_v2  ;;  %v726_v2 = vld [vmem:[#allocation2 + $0x120] sm:$0xff] }
 0x75f   :  { %v651_v48 = vsel %vm650_vm15, %v1626_v6, %v647_v41  ;;  %824 = vmatpush.msra.mxu0 %v727_v4  ;;  %v725_v41 = vld [vmem:[#allocation2 + $0x100] sm:$0xff] }
 0x760   :  { %v653_v11 = vmul.f32 %v651_v48, %v619_v5 }
 0x761   :  { %825 = vmatpush.msra.mxu0 %v726_v2 }
 0x762   :  { %v656_v40 = vmul.f32 %v1571_v34, %v653_v11 }
 0x763   :  { %826 = vmatpush.msra.mxu0 %v725_v41 }
 0x764   :  { %v659_v45 = vadd.f32 %v1572_v0, %v656_v40 }
 0x766   :  { %1455 = vmatmul.msk.f32.gmra.mxu0 %vm96_vm0, %v659_v45 }
 0x7db   :  { %v684_v49 = vpop.f32.mrf.mxu0 }
 0x7dc   :  { %v685_v54 = vadd.f32 %v1573_v28, %v684_v49 }
 0x7de   :  { %v690_v15 = vmax.f32 %v685_v54, 0.0 }
 0x7e0   :  { %1456 = vmatmul.msk.f32.vlgmr.msrb.gmra.mxu1 %vm363_vm9, %v690_v15 }
 0x7e3   :  { %v687_v5 = vpop.f32.mrf.mxu0 }
 0x7e4   :  { %v688_v23 = vadd.f32 %v1573_v28, %v687_v5 }
 0x7e6   :  { %v691_v16 = vmax.f32 %v688_v23, 0.0 }
 0x7e8   :  { %1457 = vmatmul.msk.f32.gmra.mxu1 %vm363_vm9, %v691_v16 }
 0x85d   :  { %v716_v21 = vpop.f32.mrf.mxu1 }
 0x85e   :  { %v717_v53 = vadd.f32 %v1574_v20, %v716_v21 }
 0x860   :  { %v2157_v14 = vadd.f32 %v717_v53, %v2123_v7 }
 0x862   :  { %v754_v24 = vsel %vm96_vm0, %v2157_v14, 0.0 }
 0x863   :  { %755 = vadd.xlane.f32.xlu2 %v754_v24 }
 0x865   :  { %v719_v26 = vpop.f32.mrf.mxu1 }
 0x866   :  { %v720_v30 = vadd.f32 %v1574_v20, %v719_v26  ;;  %v1575_v20 = vld [vmem:[%s2447_s5 + $0xc] ss:$0 sm:$0xff]  ;;  %v1576_v26 = vld [vmem:[%s2447_s5 + $0xd] ss:$0 sm:$0xff] }
 0x868   :  { %v2162_v38 = vadd.f32 %v720_v30, %v2128_v8 }
 0x86a   :  { %v757_v6 = vsel %vm96_vm0, %v2162_v38, 0.0 }
 0x86b   :  { %758 = vadd.xlane.f32.xlu0 %v757_v6 }
 0x8d6   :  { %v756_v44 = vpop.xlane.xlu2 %755 }
 0x8d7   :  { %v760_v32 = vmul.f32 %v756_v44, %v1792_v10 }
 0x8d9   :  { %v762_v34 = vsub.f32 %v2157_v14, %v760_v32 }
 0x8db   :  { %v764_v7 = vmul.f32 %v762_v34, %v762_v34 }
 0x8dd   :  { %v766_v36 = vsel %vm96_vm0, %v764_v7, 0.0 }
 0x8de   :  { %767 = vadd.xlane.f32.xlu1 %v766_v36  ;;  %v759_v19 = vpop.xlane.xlu0 %758 }
 0x8df   :  { %v761_v56 = vmul.f32 %v759_v19, %v1792_v10 }
 0x8e1   :  { %v763_v0 = vsub.f32 %v2162_v38, %v761_v56 }
 0x8e3   :  { %v765_v8 = vmul.f32 %v763_v0, %v763_v0 }
 0x8e5   :  { %v769_v46 = vsel %vm96_vm0, %v765_v8, 0.0 }
 0x8e6   :  { %770 = vadd.xlane.f32.xlu2 %v769_v46  ;;  %v1577_v46 = vld [vmem:[%s2447_s5 + $0x8] ss:$0 sm:$0xff] }
 0x951   :  { %v768_v48 = vpop.xlane.xlu1 %767 }
 0x952   :  { %v772_v11 = vmul.f32 %v768_v48, %v1792_v10 }
 0x954   :  { %v774_v40 = vadd.f32 1e-05, %v772_v11 }
 0x956   :  { %1627 = vrsqrt.f32 %v774_v40  ;;  %vm782_vm2 = vweird.f32 %v774_v40 }
 0x959   :  { %v771_v45 = vpop.xlane.xlu2 %770 }
 0x95a   :  { %v773_v42 = vmul.f32 %v771_v45, %v1792_v10 }
 0x95c   :  { %v1628_v50 = vpop.eup %1627  ;;  %v775_v52 = vadd.f32 1e-05, %v773_v42 }
 0x95d   :  { %v777_v28 = vmul.f32 %v1628_v50, %v774_v40  ;;  %vm783_vm1 = vweird.f32 %v1628_v50 }
 0x95e   :  { %1629 = vrsqrt.f32 %v775_v52  ;;  %vm784_vm3 = vmor %vm782_vm2, %vm783_vm1  ;;  %vm792_vm5 = vweird.f32 %v775_v52 }
 0x95f   :  { %v778_v49 = vmul.f32 %v1628_v50, %v777_v28 }
 0x961   :  { %v779_v54 = vmul.f32 0.5, %v778_v49 }
 0x963   :  { %v780_v15 = vsub.f32 1.5, %v779_v54 }
 0x964   :  { %v1630_v5 = vpop.eup %1629 }
 0x965   :  { %v781_v23 = vmul.f32 %v1628_v50, %v780_v15  ;;  %v787_v16 = vmul.f32 %v1630_v5, %v775_v52  ;;  %vm793_vm4 = vweird.f32 %v1630_v5 }
 0x966   :  { %vm794_vm6 = vmor %vm792_vm5, %vm793_vm4 }
 0x967   :  { %v785_v21 = vsel %vm784_vm3, %v1628_v50, %v781_v23  ;;  %v788_v53 = vmul.f32 %v1630_v5, %v787_v16 }
 0x968   :  { %v796_v24 = vmul.f32 %v785_v21, %v762_v34 }
 0x969   :  { %v789_v30 = vmul.f32 0.5, %v788_v53 }
 0x96a   :  { %v799_v6 = vmul.f32 %v1575_v20, %v796_v24 }
 0x96b   :  { %v790_v44 = vsub.f32 1.5, %v789_v30 }
 0x96c   :  { %v802_v32 = vadd.f32 %v1576_v26, %v799_v6 }
 0x96d   :  { %v791_v7 = vmul.f32 %v1630_v5, %v790_v44 }
 0x96e   :  { %1466 = vmatmul.msk.f32.vlgmr.msra.gmra.mxu0 %vm96_vm0, %v802_v32 }
 0x96f   :  { %v795_v36 = vsel %vm794_vm6, %v1630_v5, %v791_v7 }
 0x970   :  { %v797_v19 = vmul.f32 %v795_v36, %v763_v0 }
 0x972   :  { %v800_v56 = vmul.f32 %v1575_v20, %v797_v19 }
 0x974   :  { %v803_v8 = vadd.f32 %v1576_v26, %v800_v56 }
 0x976   :  { %1467 = vmatmul.msk.f32.gmra.mxu0 %vm96_vm0, %v803_v8 }
 0x9eb   :  { %v828_v34 = vpop.f32.mrf.mxu0 }
 0x9ec   :  { %v829_v2 = vadd.f32 %v1577_v46, %v828_v34 }
 0x9f3   :  { %v831_v57 = vpop.f32.mrf.mxu0 }
 0x9f4   :  { %v832_v4 = vadd.f32 %v1577_v46, %v831_v57 }
 0x9f6   :  { %848 = vmatpush.msrb.mxu3 %v832_v4 }
 0x9f8   :  { %849 = vmatpush.msrb.mxu3 %v829_v2 }
 0x9f9   :  { %1468 = vmatmul.msk.f32.vlgmr.msrb.gmra.mxu3 %vm184_vm8, %v1816_v58 }
 0xa01   :  { %1469 = vmatmul.msk.f32.gmra.mxu3 %vm184_vm8, %v1823_v59 }
 0xa09   :  { %1470 = vmatmul.msk.f32.gmra.mxu3 %vm184_vm8, %v1830_v60 }
 0xa11   :  { %1471 = vmatmul.msk.f32.gmra.mxu3 %vm184_vm8, %v1837_v61 }
 0xa19   :  { %1472 = vmatmul.msk.f32.gmra.mxu3 %vm184_vm8, %v1844_v62 }
 0xa21   :  { %1473 = vmatmul.msk.f32.gmra.mxu3 %vm184_vm8, %v1851_v63 }
 0xa29   :  { %1474 = vmatmul.msk.f32.gmra.mxu3 %vm184_vm8, %v1858_v1 }
 0xa31   :  { %1475 = vmatmul.msk.f32.gmra.mxu3 %vm184_vm8, %v1865_v3 }
 0xa7c   :  { %v2201_v58 = vpop.f32.mrf.mxu3 }
 0xa7d   :  { %v875_v54 = vmul.f32 %v2201_v58, %v1915_v22 }
 0xa84   :  { %v2203_v59 = vpop.f32.mrf.mxu3 }
 0xa85   :  { %v1562_v60 = vpack.i.bf16 %v2201_v58, %v2203_v59  ;;  %v876_v5 = vmul.f32 %v2203_v59, %v1924_v25 }
 0xa8c   :  { %v2207_v61 = vpop.f32.mrf.mxu3 }
 0xa8d   :  { %v877_v23 = vmul.f32 %v2207_v61, %v1932_v27 }
 0xa94   :  { %v2209_v0 = vpop.f32.mrf.mxu3 }
 0xa95   :  { %v1557_v62 = vpack.i.bf16 %v2207_v61, %v2209_v0  ;;  %v878_v22 = vmul.f32 %v2209_v0, %v1940_v29 }
 0xa9c   :  { %v2213_v63 = vpop.f32.mrf.mxu3 }
 0xaa4   :  { %v2215_v1 = vpop.f32.mrf.mxu3 }
 0xaa5   :  { %v1552_v3 = vpack.i.bf16 %v2213_v63, %v2215_v1  ;;  %901 = vrot.lane.b32.xlu2 %v2215_v1, %s1735_s28  ;;  %v880_v25 = vmul.f32 %v2215_v1, %v1956_v33 }
 0xaac   :  { %v2221_v41 = vpop.f32.mrf.mxu3 }
 0xaad   :  { %893 = vrot.lane.b32.xlu2 %v2203_v59, %s1735_s28  ;;  %903 = vrot.lane.b32.xlu1 %v2221_v41, %s1735_s28  ;;  %v881_v27 = vmul.f32 %v2221_v41, %v1964_v35 }
 0xab4   :  { %v2227_v48 = vpop.f32.mrf.mxu3 }
 0xab5   :  { %897 = vrot.lane.b32.xlu1 %v2209_v0, %s1735_s28  ;;  %905 = vrot.lane.b32.xlu0 %v2227_v48, %s1735_s28  ;;  %v882_v15 = vmul.f32 %v2227_v48, %v1972_v37  ;;  %v879_v37 = vmul.f32 %v2213_v63, %v1948_v31 }
 0xabd   :  { %891 = vrot.lane.b32.xlu1 %v2201_v58, %s1735_s28  ;;  %899 = vrot.lane.b32.xlu0 %v2213_v63, %s1735_s28 }
 0xac5   :  { %895 = vrot.lane.b32.xlu0 %v2207_v61, %s1735_s28 }
 0xaff   :  { %v902_v45 = vpop.permute.xlu2 %901 }
 0xb07   :  { %v894_v28 = vpop.permute.xlu2 %893 }
 0xb1f   :  { %v904_v40 = vpop.permute.xlu1 %903 }
 0xb27   :  { %v906_v11 = vpop.permute.xlu0 %905  ;;  %v898_v50 = vpop.permute.xlu1 %897 }
 0xb28   :  { %1476 = vmatpush.xpose.msk.msrb.mxu2 %vm96_vm0, %v906_v11  ;;  %1510 = vmatpush.xpose.msk.msra.mxu3 %vm96_vm0, %v906_v11 }
 0xb2c   :  { %1477 = vmatpush.xpose.msk.msrb.mxu2 %vm96_vm0, %v904_v40  ;;  %1511 = vmatpush.xpose.msk.msra.mxu3 %vm96_vm0, %v904_v40 }
 0xb2f   :  { %v900_v42 = vpop.permute.xlu0 %899  ;;  %v892_v49 = vpop.permute.xlu1 %891 }
 0xb30   :  { %1478 = vmatpush.xpose.msk.msrb.mxu2 %vm96_vm0, %v902_v45  ;;  %1512 = vmatpush.xpose.msk.msra.mxu3 %vm96_vm0, %v902_v45 }
 0xb34   :  { %1479 = vmatpush.xpose.msk.msrb.mxu2 %vm96_vm0, %v900_v42  ;;  %1513 = vmatpush.xpose.msk.msra.mxu3 %vm96_vm0, %v900_v42 }
 0xb37   :  { %v896_v52 = vpop.permute.xlu0 %895 }
 0xb38   :  { %1480 = vmatpush.xpose.msk.msrb.mxu2 %vm96_vm0, %v898_v50  ;;  %1514 = vmatpush.xpose.msk.msra.mxu3 %vm96_vm0, %v898_v50 }
 0xb3c   :  { %1481 = vmatpush.xpose.msk.msrb.mxu2 %vm96_vm0, %v896_v52  ;;  %1515 = vmatpush.xpose.msk.msra.mxu3 %vm96_vm0, %v896_v52 }
 0xb40   :  { %1482 = vmatpush.xpose.msk.msrb.mxu2 %vm96_vm0, %v894_v28  ;;  %1516 = vmatpush.xpose.msk.msra.mxu3 %vm96_vm0, %v894_v28 }
 0xb44   :  { %1483 = vmatpush.xpose.msk.msrb.mxu2 %vm96_vm0, %v892_v49  ;;  %1517 = vmatpush.xpose.msk.msra.mxu3 %vm96_vm0, %v892_v49 }
 0xb47   :  { %1484 = vmatmul.msk.f32.vlgmr.msrb.gmra.mxu2 %vm96_vm0, %v875_v54  ;;  %1491 = vmatmul.msk.f32.vlgmr.msra.gmra.mxu3 %vm96_vm0, %v882_v15 }
 0xb4f   :  { %1485 = vmatmul.msk.f32.gmra.mxu2 %vm96_vm0, %v876_v5 }
 0xb57   :  { %1486 = vmatmul.msk.f32.gmra.mxu2 %vm96_vm0, %v877_v23 }
 0xb5f   :  { %1487 = vmatmul.msk.f32.gmra.mxu2 %vm96_vm0, %v878_v22 }
 0xb67   :  { %1488 = vmatmul.msk.f32.gmra.mxu2 %vm96_vm0, %v879_v37 }
 0xb6f   :  { %1489 = vmatmul.msk.f32.gmra.mxu2 %vm96_vm0, %v880_v25 }
 0xb77   :  { %1490 = vmatmul.msk.f32.gmra.mxu2 %vm96_vm0, %v881_v27 }
 0xbca   :  { %v964_v16 = vpop.f32.mrf.mxu2 }
 0xbcb   :  { %v965_v29 = vadd.f32 %v964_v16, %v1980_v39 }
 0xbcd   :  { %v988_v20 = vsel %vm363_vm9, %v965_v29, -inf }
 0xbce   :  { %989 = vmax.xlane.f32.xlu0 %v988_v20 }
 0xbd2   :  { %v967_v21 = vpop.f32.mrf.mxu2 }
 0xbd3   :  { %v968_v31 = vadd.f32 %v967_v21, %v1987_v43 }
 0xbd5   :  { %v991_v53 = vsel %vm363_vm9, %v968_v31, -inf }
 0xbd6   :  { %992 = vmax.xlane.f32.xlu2 %v991_v53 }
 0xbda   :  { %v970_v33 = vpop.f32.mrf.mxu2 }
 0xbdb   :  { %v2284_v24 = vadd.f32 %v970_v33, %v1994_v47  ;;  %v1547_v47 = vpack.i.bf16 %v2221_v41, %v2227_v48 }
 0xbdd   :  { %v994_v35 = vsel %vm363_vm9, %v2284_v24, -inf }
 0xbde   :  { %995 = vmax.xlane.f32.xlu1 %v994_v35 }
 0xbe2   :  { %v973_v26 = vpop.f32.mrf.mxu2 }
 0xbe3   :  { %v974_v39 = vadd.f32 %v973_v26, %v2004_v51 }
 0xbe5   :  { %v997_v30 = vsel %vm363_vm9, %v974_v39, -inf }
 0xbe6   :  { %998 = vmax.xlane.f32.xlu0 %v997_v30 }
 0xbea   :  { %v976_v6 = vpop.f32.mrf.mxu2 }
 0xbeb   :  { %v977_v43 = vadd.f32 %v976_v6, %v2011_v55  ;;  %v985_v55 = vpop.f32.mrf.mxu3 }
 0xbec   :  { %v2303_v56 = vadd.f32 %v985_v55, %v2042_v13 }
 0xbed   :  { %v1000_v44 = vsel %vm363_vm9, %v977_v43, -inf }
 0xbee   :  { %1001 = vmax.xlane.f32.xlu2 %v1000_v44  ;;  %v1009_v34 = vsel %vm363_vm9, %v2303_v56, -inf }
 0xbf2   :  { %v979_v32 = vpop.f32.mrf.mxu2 }
 0xbf3   :  { %v980_v19 = vadd.f32 %v979_v32, %v2032_v9 }
 0xbf5   :  { %v1003_v8 = vsel %vm363_vm9, %v980_v19, -inf }
 0xbf7   :  { %1553 = vrot.lane.b32.xlu1 %v1552_v3, %s1736_s4 }
 0xbfa   :  { %v982_v7 = vpop.f32.mrf.mxu2  ;;  %1548 = vrot.lane.b32.xlu0 %v1547_v47, %s1736_s4 }
 0xbfb   :  { %v983_v51 = vadd.f32 %v982_v7, %v2022_v17 }
 0xbfd   :  { %v1006_v36 = vsel %vm363_vm9, %v983_v51, -inf }
 0xbfe   :  { %1007 = vmax.xlane.f32.xlu2 %v1006_v36 }
 0xc21   :  { %1004 = vmax.xlane.f32.xlu1 %v1003_v8 }
 0xc24   :  { %1010 = vmax.xlane.f32.xlu0 %v1009_v34 }
 0xc3a   :  { %1563 = vrot.lane.b32.xlu1 %v1562_v60, %s1736_s4 }
 0xc41   :  { %v990_v17 = vpop.xlane.xlu0 %989 }
 0xc42   :  { %v1012_v46 = vsub.f32 %v965_v29, %v990_v17 }
 0xc44   :  { %v1020_v57 = vmul.f32 1.442695, %v1012_v46 }
 0xc46   :  { %1631 = vpow2.f32 %v1020_v57 }
 0xc49   :  { %v993_v4 = vpop.xlane.xlu2 %992 }
 0xc4a   :  { %v1013_v2 = vsub.f32 %v968_v31, %v993_v4 }
 0xc4c   :  { %v2312_v9 = vpop.eup %1631  ;;  %v1022_v63 = vmul.f32 1.442695, %v1013_v2 }
 0xc4d   :  { %v1036_v13 = vsel %vm363_vm9, %v2312_v9, 0.0 }
 0xc4e   :  { %1037 = vadd.xlane.f32.xlu2 %v1036_v13  ;;  %1633 = vpow2.f32 %v1022_v63 }
 0xc51   :  { %v996_v42 = vpop.xlane.xlu1 %995 }
 0xc54   :  { %v2316_v58 = vpop.eup %1633 }
 0xc55   :  { %v1039_v48 = vsel %vm363_vm9, %v2316_v58, 0.0 }
 0xc59   :  { %v999_v1 = vpop.xlane.xlu0 %998 }
 0xc5a   :  { %v1015_v3 = vsub.f32 %v974_v39, %v999_v1 }
 0xc5c   :  { %v1026_v41 = vmul.f32 1.442695, %v1015_v3 }
 0xc5e   :  { %1635 = vpow2.f32 %v1026_v41 }
 0xc61   :  { %v1002_v59 = vpop.xlane.xlu2 %1001 }
 0xc62   :  { %v1016_v60 = vsub.f32 %v977_v43, %v1002_v59 }
 0xc64   :  { %v2320_v11 = vpop.eup %1635  ;;  %v1028_v40 = vmul.f32 1.442695, %v1016_v60  ;;  %1040 = vadd.xlane.f32.xlu1 %v1039_v48 }
 0xc65   :  { %v1045_v45 = vsel %vm363_vm9, %v2320_v11, 0.0 }
 0xc66   :  { %1637 = vpow2.f32 %v1028_v40  ;;  %1558 = vrot.lane.b32.xlu2 %v1557_v62, %s1736_s4  ;;  %1046 = vadd.xlane.f32.xlu0 %v1045_v45  ;;  %v1014_v62 = vsub.f32 %v2284_v24, %v996_v42  ;;  %s1737_s4 = smov [#allocation5]  }
 0xc67   :  { %s1401_s30 = sshll.u32 %s1737_s4, 4  ;;  %s1402_s30 = int_to_ptr.vmem [resolvable:$true] %s1401_s30 }
 0xc68   :  { %v1024_v27 = vmul.f32 1.442695, %v1014_v62  ;;  %v1674_v62 = vld [vmem:[%s2444_s2 + $0x40] sm:$0xff] }
 0xc69   :  { %v1554_v54 = vpop.permute.xlu1 %1553 }
 0xc6a   :  { %v1555_v5 = vunpack.i.l.bf16 %v1554_v54  ;;  %v1556_v37 = vunpack.i.h.bf16 %v1554_v54 }
 0xc6c   :  { %v2328_v50 = vpop.eup %1637  ;;  %v1549_v52 = vpop.permute.xlu0 %1548 }
 0xc6d   :  { %v1550_v28 = vunpack.i.l.bf16 %v1549_v52  ;;  %v1048_v49 = vsel %vm363_vm9, %v2328_v50, 0.0  ;;  %v1551_v15 = vunpack.i.h.bf16 %v1549_v52 }
 0xc6e   :  { %1049 = vadd.xlane.f32.xlu0 %v1048_v49 }
 0xc6f   :  { %1132 = vmatpush.msra.mxu1 %v1550_v28 }
 0xc71   :  { %v1008_v23 = vpop.xlane.xlu2 %1007  ;;  %1133 = vmatpush.msra.mxu1 %v1551_v15 }
 0xc72   :  { %v1018_v22 = vsub.f32 %v983_v51, %v1008_v23 }
 0xc73   :  { %1134 = vmatpush.msra.mxu1 %v1555_v5  ;;  %v1671_v5 = vld [vmem:[%s2444_s2 + $0x70] sm:$0xff] }
 0xc74   :  { %v1032_v61 = vmul.f32 1.442695, %v1018_v22  ;;  %v1672_v22 = vld [vmem:[%s2444_s2 + $0x60] sm:$0xff] }
 0xc75   :  { %1135 = vmatpush.msra.mxu1 %v1556_v37 }
 0xc76   :  { %1639 = vpow2.f32 %v1032_v61  ;;  %v1673_v61 = vld [vmem:[%s2444_s2 + $0x50] sm:$0xff] }
 0xc77   :  { %1641 = vpow2.f32 %v1024_v27  ;;  %v1675_v27 = vld [vmem:[%s2444_s2 + $0x30] sm:$0xff] }
 0xc7c   :  { %v2332_v0 = vpop.eup %1639 }
 0xc7d   :  { %v1054_v25 = vsel %vm363_vm9, %v2332_v0, 0.0  ;;  %v1642_v16 = vpop.eup %1641 }
 0xc7e   :  { %1055 = vadd.xlane.f32.xlu1 %v1054_v25  ;;  %v1042_v29 = vsel %vm363_vm9, %v1642_v16, 0.0 }
 0xc8f   :  { %1043 = vadd.xlane.f32.xlu2 %v1042_v29  ;;  %v1676_v29 = vld [vmem:[%s2444_s2 + $0x20] sm:$0xff] }
 0xc94   :  { %v1005_v20 = vpop.xlane.xlu1 %1004 }
 0xc95   :  { %v1017_v21 = vsub.f32 %v980_v19, %v1005_v20 }
 0xc97   :  { %v1030_v31 = vmul.f32 1.442695, %v1017_v21  ;;  %v1011_v53 = vpop.xlane.xlu0 %1010  ;;  %v1677_v21 = vld [vmem:[%s2444_s2 + $0x10] sm:$0xff] }
 0xc98   :  { %v1019_v33 = vsub.f32 %v2303_v56, %v1011_v53  ;;  %v1678_v53 = vld [vmem:[%s2444_s2] sm:$0xff] }
 0xc99   :  { %1643 = vpow2.f32 %v1030_v31 }
 0xc9a   :  { %v1034_v35 = vmul.f32 1.442695, %v1019_v33 }
 0xc9c   :  { %1645 = vpow2.f32 %v1034_v35  ;;  %v732_v35 = vld [vmem:[#allocation2 + $0x168] sm:$0xff] }
 0xc9f   :  { %v1644_v24 = vpop.eup %1643 }
 0xca0   :  { %v1051_v26 = vsel %vm363_vm9, %v1644_v24, 0.0 }
 0xca1   :  { %1052 = vadd.xlane.f32.xlu0 %v1051_v26  ;;  %v730_v26 = vld [vmem:[#allocation2 + $0x128] sm:$0xff] }
 0xca2   :  { %v1646_v39 = vpop.eup %1645 }
 0xca3   :  { %v1057_v30 = vsel %vm363_vm9, %v1646_v39, 0.0 }
 0xca4   :  { %1058 = vadd.xlane.f32.xlu2 %v1057_v30 }
 0xcac   :  { %v1564_v32 = vpop.permute.xlu1 %1563 }
 0xcad   :  { %v1565_v51 = vunpack.i.l.bf16 %v1564_v32  ;;  %v1566_v36 = vunpack.i.h.bf16 %v1564_v32 }
 0xcc1   :  { %v1038_v6 = vpop.xlane.xlu2 %1037 }
 0xcc2   :  { %1647 = vrcp.f32 %v1038_v6 }
 0xcc8   :  { %v1648_v7 = vpop.eup %1647 }
 0xcc9   :  { %v1559_v43 = vpop.permute.xlu2 %1558  ;;  %v1068_v55 = vmul.f32 %v1648_v7, %v2312_v9 }
 0xcca   :  { %v1560_v44 = vunpack.i.l.bf16 %v1559_v43  ;;  %v1561_v47 = vunpack.i.h.bf16 %v1559_v43 }
 0xccc   :  { %1136 = vmatpush.msra.mxu1 %v1560_v44 }
 0xcce   :  { %1137 = vmatpush.msra.mxu1 %v1561_v47 }
 0xcd0   :  { %1138 = vmatpush.msra.mxu1 %v1565_v51 }
 0xcd2   :  { %1139 = vmatpush.msra.mxu1 %v1566_v36 }
 0xcd3   :  { %1492 = vmatmul.msk.f32.vlgmr.msra.gmra.mxu1 %vm363_vm9, %v1068_v55 }
 0xcd7   :  { %v1041_v19 = vpop.xlane.xlu1 %1040 }
 0xcd8   :  { %1649 = vrcp.f32 %v1041_v19 }
 0xcd9   :  { %v1047_v17 = vpop.xlane.xlu0 %1046 }
 0xcde   :  { %v1650_v56 = vpop.eup %1649 }
 0xcdf   :  { %v1069_v8 = vmul.f32 %v1650_v56, %v2316_v58 }
 0xce1   :  { %1493 = vmatmul.msk.f32.gmra.mxu1 %vm363_vm9, %v1069_v8  ;;  %v1050_v13 = vpop.xlane.xlu0 %1049 }
 0xcf1   :  { %v1056_v3 = vpop.xlane.xlu1 %1055 }
 0xd02   :  { %v1044_v34 = vpop.xlane.xlu2 %1043 }
 0xd03   :  { %1651 = vrcp.f32 %v1044_v34 }
 0xd04   :  { %1653 = vrcp.f32 %v1047_v17 }
 0xd05   :  { %1655 = vrcp.f32 %v1050_v13  ;;  %v736_v13 = vld [vmem:[#allocation2 + $0x170] sm:$0xff] }
 0xd09   :  { %v1652_v46 = vpop.eup %1651 }
 0xd0a   :  { %v1070_v57 = vmul.f32 %v1652_v46, %v1642_v16  ;;  %v1654_v9 = vpop.eup %1653 }
 0xd0b   :  { %v1071_v4 = vmul.f32 %v1654_v9, %v2320_v11  ;;  %v1656_v63 = vpop.eup %1655  ;;  %v735_v9 = vld [vmem:[#allocation2 + $0x150] sm:$0xff] }
 0xd0c   :  { %1494 = vmatmul.msk.f32.gmra.mxu1 %vm363_vm9, %v1070_v57  ;;  %v1072_v1 = vmul.f32 %v1656_v63, %v2328_v50 }
 0xd14   :  { %1495 = vmatmul.msk.f32.gmra.mxu1 %vm363_vm9, %v1071_v4  ;;  %v1053_v2 = vpop.xlane.xlu0 %1052  ;;  %v734_v4 = vld [vmem:[#allocation2 + $0x130] sm:$0xff] }
 0xd15   :  { %1657 = vrcp.f32 %v1053_v2  ;;  %v733_v2 = vld [vmem:[#allocation2 + $0x110] sm:$0xff] }
 0xd16   :  { %1659 = vrcp.f32 %v1056_v3 }
 0xd17   :  { %v1059_v59 = vpop.xlane.xlu2 %1058 }
 0xd18   :  { %1661 = vrcp.f32 %v1059_v59  ;;  %v742_v59 = vld [vmem:[#allocation2 + $0x1b8] sm:$0xff] }
 0xd1b   :  { %v1658_v41 = vpop.eup %1657 }
 0xd1c   :  { %1496 = vmatmul.msk.f32.gmra.mxu1 %vm363_vm9, %v1072_v1  ;;  %v1073_v58 = vmul.f32 %v1658_v41, %v1644_v24  ;;  %v1660_v60 = vpop.eup %1659  ;;  %v731_v24 = vld [vmem:[#allocation2 + $0x148] sm:$0xff]  ;;  %v744_v41 = vld [vmem:[#allocation2 + $0x1f8] sm:$0xff] }
 0xd1d   :  { %v1074_v48 = vmul.f32 %v1660_v60, %v2332_v0 }
 0xd1e   :  { %v1662_v11 = vpop.eup %1661 }
 0xd1f   :  { %v1075_v40 = vmul.f32 %v1662_v11, %v1646_v39  ;;  %v729_v39 = vld [vmem:[#allocation2 + $0x108] sm:$0xff]  ;;  %v741_v11 = vld [vmem:[#allocation2 + $0x198] sm:$0xff] }
 0xd24   :  { %1497 = vmatmul.msk.f32.gmra.mxu1 %vm363_vm9, %v1073_v58  ;;  %v743_v58 = vld [vmem:[#allocation2 + $0x1d8] sm:$0xff] }
 0xd2c   :  { %1498 = vmatmul.msk.f32.gmra.mxu1 %vm363_vm9, %v1074_v48 }
 0xd34   :  { %1499 = vmatmul.msk.f32.gmra.mxu1 %vm363_vm9, %v1075_v40 }
 0xd50   :  { %v1141_v45 = vpop.f32.mrf.mxu1 }
 0xd51   :  { %v1165_v33 = vmul.f32 %v1678_v53, %v1141_v45 }
 0xd5e   :  { %v1144_v42 = vpop.f32.mrf.mxu1 }
 0xd5f   :  { %v1166_v31 = vmul.f32 %v1677_v21, %v1144_v42  ;;  %v740_v42 = vld [vmem:[#allocation2 + $0x178] sm:$0xff] }
 0xd89   :  { %v1147_v50 = vpop.f32.mrf.mxu1 }
 0xd8a   :  { %v1167_v20 = vmul.f32 %v1676_v29, %v1147_v50 }
 0xd91   :  { %v1150_v52 = vpop.f32.mrf.mxu1 }
 0xd92   :  { %v1168_v16 = vmul.f32 %v1675_v27, %v1150_v52 }
 0xd99   :  { %v1153_v28 = vpop.f32.mrf.mxu1 }
 0xd9a   :  { %v1169_v25 = vmul.f32 %v1674_v62, %v1153_v28 }
 0xda1   :  { %v1156_v49 = vpop.f32.mrf.mxu1 }
 0xda2   :  { %v1170_v0 = vmul.f32 %v1673_v61, %v1156_v49 }
 0xda9   :  { %v1159_v54 = vpop.f32.mrf.mxu1 }
 0xdaa   :  { %v1171_v37 = vmul.f32 %v1672_v22, %v1159_v54 }
 0xdb1   :  { %v1162_v15 = vpop.f32.mrf.mxu1 }
 0xdb2   :  { %v1172_v23 = vmul.f32 %v1671_v5, %v1162_v15 }
 0xdb4   :  { %1181 = vmatpush.msrb.mxu0 %v1172_v23  ;;  %v1579_v23 = vld [vmem:[%s2447_s5 + $0xe] ss:$0 sm:$0xff] }
 0xdb6   :  { %1182 = vmatpush.msrb.mxu0 %v1171_v37 }
 0xdb8   :  { %1183 = vmatpush.msrb.mxu0 %v1170_v0  ;;  %v1580_v0 = vld [vmem:[%s2447_s5 + $0xf] ss:$0 sm:$0xff] }
 0xdba   :  { %1184 = vmatpush.msrb.mxu0 %v1169_v25 }
 0xdbc   :  { %1185 = vmatpush.msrb.mxu0 %v1168_v16 }
 0xdbe   :  { %1186 = vmatpush.msrb.mxu0 %v1167_v20 }
 0xdc0   :  { %1187 = vmatpush.msrb.mxu0 %v1166_v31 }
 0xdc2   :  { %1188 = vmatpush.msrb.mxu0 %v1165_v33  ;;  %v739_v33 = vld [vmem:[#allocation2 + $0x158] sm:$0xff] }
 0xdc3   :  { %1500 = vmatmul.msk.f32.vlgmr.msrb.gmra.mxu0 %vm363_vm9, %v2106_v18  ;;  %v1578_v18 = vld [vmem:[%s2447_s5 + $0x9] ss:$0 sm:$0xff] }
 0xdc4   :  { %1215 = vmatpush.msra.mxu0 %v732_v35  ;;  %v738_v35 = vld [vmem:[#allocation2 + $0x138] sm:$0xff] }
 0xdc6   :  { %1216 = vmatpush.msra.mxu0 %v731_v24  ;;  %v737_v24 = vld [vmem:[#allocation2 + $0x118] sm:$0xff] }
 0xdc8   :  { %1217 = vmatpush.msra.mxu0 %v730_v26  ;;  %v1581_v26 = vld [vmem:[%s2447_s5 + $0xa] ss:$0 sm:$0xff] }
 0xdca   :  { %1218 = vmatpush.msra.mxu0 %v729_v39 }
 0xdcb   :  { %1501 = vmatmul.msk.f32.gmra.mxu0 %vm363_vm9, %v2113_v12 }
 0xdcc   :  { %1297 = vmatpush.msrb.mxu0 %v736_v13 }
 0xdce   :  { %1298 = vmatpush.msrb.mxu0 %v735_v9 }
 0xdd0   :  { %1299 = vmatpush.msrb.mxu0 %v734_v4 }
 0xdd2   :  { %1300 = vmatpush.msrb.mxu0 %v733_v2 }
 0xe40   :  { %v1190_v30 = vpop.f32.mrf.mxu0 }
 0xe41   :  { %1502 = vmatmul.msk.f32.vlgmr.msra.gmra.mxu0 %vm96_vm0, %v1190_v30 }
 0xe42   :  { %1325 = vmatpush.msra.mxu0 %v744_v41 }
 0xe44   :  { %1326 = vmatpush.msra.mxu0 %v743_v58 }
 0xe46   :  { %1327 = vmatpush.msra.mxu0 %v742_v59 }
 0xe48   :  { %v1193_v6 = vpop.f32.mrf.mxu0  ;;  %1328 = vmatpush.msra.mxu0 %v741_v11 }
 0xe49   :  { %1503 = vmatmul.msk.f32.gmra.mxu0 %vm96_vm0, %v1193_v6 }
 0xe4a   :  { %1329 = vmatpush.msra.mxu0 %v740_v42 }
 0xe4c   :  { %1330 = vmatpush.msra.mxu0 %v739_v33 }
 0xe4e   :  { %1331 = vmatpush.msra.mxu0 %v738_v35 }
 0xe50   :  { %1332 = vmatpush.msra.mxu0 %v737_v24 }
 0xebe   :  { %v1220_v43 = vpop.f32.mrf.mxu0 }
 0xebf   :  { %v1221_v44 = vadd.f32 %v1578_v18, %v1220_v43 }
 0xec1   :  { %v2388_v32 = vadd.f32 %v1221_v44, %v2157_v14 }
 0xec3   :  { %v1228_v12 = vsel %vm96_vm0, %v2388_v32, 0.0 }
 0xec4   :  { %1229 = vadd.xlane.f32.xlu0 %v1228_v12  ;;  %v1582_v12 = vld [vmem:[%s2447_s5 + $0xb] ss:$0 sm:$0xff] }
 0xec6   :  { %v1223_v47 = vpop.f32.mrf.mxu0 }
 0xec7   :  { %v1224_v7 = vadd.f32 %v1578_v18, %v1223_v47 }
 0xec9   :  { %v2393_v51 = vadd.f32 %v1224_v7, %v2162_v38 }
 0xecb   :  { %v1231_v36 = vsel %vm96_vm0, %v2393_v51, 0.0 }
 0xecc   :  { %1232 = vadd.xlane.f32.xlu1 %v1231_v36 }
 0xf37   :  { %v1230_v55 = vpop.xlane.xlu0 %1229 }
 0xf38   :  { %v1234_v19 = vmul.f32 %v1230_v55, %v1792_v10 }
 0xf3a   :  { %v1236_v56 = vsub.f32 %v2388_v32, %v1234_v19 }
 0xf3c   :  { %v1238_v14 = vmul.f32 %v1236_v56, %v1236_v56 }
 0xf3e   :  { %v1240_v8 = vsel %vm96_vm0, %v1238_v14, 0.0 }
 0xf3f   :  { %v1233_v34 = vpop.xlane.xlu1 %1232  ;;  %1241 = vadd.xlane.f32.xlu2 %v1240_v8 }
 0xf40   :  { %v1235_v17 = vmul.f32 %v1233_v34, %v1792_v10 }
 0xf42   :  { %v1237_v46 = vsub.f32 %v2393_v51, %v1235_v17 }
 0xf44   :  { %v1239_v38 = vmul.f32 %v1237_v46, %v1237_v46 }
 0xf46   :  { %v1243_v57 = vsel %vm96_vm0, %v1239_v38, 0.0 }
 0xf47   :  { %1244 = vadd.xlane.f32.xlu0 %v1243_v57 }
 0xfb2   :  { %v1242_v63 = vpop.xlane.xlu2 %1241 }
 0xfb3   :  { %v1246_v1 = vmul.f32 %v1242_v63, %v1792_v10 }
 0xfb5   :  { %v1248_v3 = vadd.f32 1e-05, %v1246_v1 }
 0xfb7   :  { %1663 = vrsqrt.f32 %v1248_v3  ;;  %vm1256_vm8 = vweird.f32 %v1248_v3 }
 0xfba   :  { %v1245_v60 = vpop.xlane.xlu0 %1244 }
 0xfbb   :  { %v1247_v48 = vmul.f32 %v1245_v60, %v1792_v10 }
 0xfbd   :  { %v1664_v40 = vpop.eup %1663  ;;  %v1249_v45 = vadd.f32 1e-05, %v1247_v48 }
 0xfbe   :  { %v1251_v50 = vmul.f32 %v1664_v40, %v1248_v3  ;;  %vm1257_vm7 = vweird.f32 %v1664_v40 }
 0xfbf   :  { %1665 = vrsqrt.f32 %v1249_v45  ;;  %vm1258_vm10 = vmor %vm1256_vm8, %vm1257_vm7  ;;  %vm1266_vm12 = vweird.f32 %v1249_v45 }
 0xfc0   :  { %v1252_v52 = vmul.f32 %v1664_v40, %v1251_v50 }
 0xfc2   :  { %v1253_v28 = vmul.f32 0.5, %v1252_v52  ;;  %v1583_v52 = vld [vmem:[%s2447_s5 + $0x10] ss:$0 sm:$0xff] }
 0xfc4   :  { %v1254_v49 = vsub.f32 1.5, %v1253_v28 }
 0xfc5   :  { %v1666_v54 = vpop.eup %1665 }
 0xfc6   :  { %v1255_v15 = vmul.f32 %v1664_v40, %v1254_v49  ;;  %v1261_v5 = vmul.f32 %v1666_v54, %v1249_v45  ;;  %vm1267_vm11 = vweird.f32 %v1666_v54 }
 0xfc7   :  { %vm1268_vm13 = vmor %vm1266_vm12, %vm1267_vm11 }
 0xfc8   :  { %v1259_v22 = vsel %vm1258_vm10, %v1664_v40, %v1255_v15  ;;  %v1262_v37 = vmul.f32 %v1666_v54, %v1261_v5 }
 0xfc9   :  { %v1270_v61 = vmul.f32 %v1259_v22, %v1236_v56 }
 0xfca   :  { %v1263_v62 = vmul.f32 0.5, %v1262_v37 }
 0xfcb   :  { %v1273_v25 = vmul.f32 %v1579_v23, %v1270_v61 }
 0xfcc   :  { %v1264_v27 = vsub.f32 1.5, %v1263_v62 }
 0xfcd   :  { %v1276_v16 = vadd.f32 %v1580_v0, %v1273_v25 }
 0xfce   :  { %v1265_v29 = vmul.f32 %v1666_v54, %v1264_v27 }
 0xfcf   :  { %1504 = vmatmul.msk.f32.vlgmr.msrb.gmra.mxu0 %vm96_vm0, %v1276_v16 }
 0xfd0   :  { %v1269_v20 = vsel %vm1268_vm13, %v1666_v54, %v1265_v29 }
 0xfd1   :  { %v1271_v21 = vmul.f32 %v1269_v20, %v1237_v46 }
 0xfd3   :  { %v1274_v31 = vmul.f32 %v1579_v23, %v1271_v21 }
 0xfd5   :  { %v1277_v53 = vadd.f32 %v1580_v0, %v1274_v31 }
 0xfd7   :  { %1505 = vmatmul.msk.f32.gmra.mxu0 %vm96_vm0, %v1277_v53 }
0x104c   :  { %v1302_v39 = vpop.f32.mrf.mxu0 }
0x104d   :  { %v1303_v30 = vadd.f32 %v1581_v26, %v1302_v39 }
0x104f   :  { %v1308_v6 = vmax.f32 %v1303_v30, 0.0 }
0x1051   :  { %1506 = vmatmul.msk.f32.vlgmr.msra.gmra.mxu0 %vm363_vm9, %v1308_v6 }
0x1054   :  { %v1305_v18 = vpop.f32.mrf.mxu0 }
0x1055   :  { %v1306_v43 = vadd.f32 %v1581_v26, %v1305_v18 }
0x1057   :  { %v1309_v44 = vmax.f32 %v1306_v43, 0.0 }
0x1059   :  { %1507 = vmatmul.msk.f32.gmra.mxu0 %vm363_vm9, %v1309_v44 }
0x10ce   :  { %v1334_v47 = vpop.f32.mrf.mxu0 }
0x10cf   :  { %v1335_v7 = vadd.f32 %v1582_v12, %v1334_v47 }
0x10d1   :  { %v1340_v36 = vadd.f32 %v1335_v7, %v2388_v32 }
0x10d3   :  { %v1345_v55 = vsel %vm96_vm0, %v1340_v36, 0.0 }
0x10d4   :  { %1346 = vadd.xlane.f32.xlu1 %v1345_v55 }
0x10d6   :  { %v1337_v19 = vpop.f32.mrf.mxu0 }
0x10d7   :  { %v1338_v56 = vadd.f32 %v1582_v12, %v1337_v19 }
0x10d9   :  { %v1341_v14 = vadd.f32 %v1338_v56, %v2393_v51 }
0x10db   :  { %v1348_v8 = vsel %vm96_vm0, %v1341_v14, 0.0 }
0x10dc   :  { %1349 = vadd.xlane.f32.xlu2 %v1348_v8 }
0x1147   :  { %v1347_v34 = vpop.xlane.xlu1 %1346 }
0x1148   :  { %v1351_v17 = vmul.f32 %v1347_v34, %v1792_v10 }
0x114a   :  { %v1353_v46 = vsub.f32 %v1340_v36, %v1351_v17 }
0x114c   :  { %v1355_v38 = vmul.f32 %v1353_v46, %v1353_v46 }
0x114e   :  { %v1357_v57 = vsel %vm96_vm0, %v1355_v38, 0.0 }
0x114f   :  { %1358 = vadd.xlane.f32.xlu0 %v1357_v57  ;;  %v1350_v13 = vpop.xlane.xlu2 %1349 }
0x1150   :  { %v1352_v32 = vmul.f32 %v1350_v13, %v1792_v10 }
0x1152   :  { %v1354_v9 = vsub.f32 %v1341_v14, %v1352_v32 }
0x1154   :  { %v1356_v4 = vmul.f32 %v1354_v9, %v1354_v9 }
0x1156   :  { %v1360_v2 = vsel %vm96_vm0, %v1356_v4, 0.0 }
0x1157   :  { %1361 = vadd.xlane.f32.xlu1 %v1360_v2 }
0x11c2   :  { %v1359_v51 = vpop.xlane.xlu0 %1358 }
0x11c3   :  { %v1363_v63 = vmul.f32 %v1359_v51, %v1792_v10 }
0x11c5   :  { %v1365_v1 = vadd.f32 1e-05, %v1363_v63 }
0x11c7   :  { %1667 = vrsqrt.f32 %v1365_v1  ;;  %vm1373_vm14 = vweird.f32 %v1365_v1 }
0x11ca   :  { %v1362_v3 = vpop.xlane.xlu1 %1361 }
0x11cb   :  { %v1364_v41 = vmul.f32 %v1362_v3, %v1792_v10  ;;  %v1584_v10 = vld [vmem:[%s2447_s5 + $0x11] ss:$0 sm:$0xff]  ;;  %s1738_s5 = smov 128  }
0x11cd   :  { %v1668_v58 = vpop.eup %1667  ;;  %v1366_v59 = vadd.f32 1e-05, %v1364_v41 }
0x11ce   :  { %v1368_v60 = vmul.f32 %v1668_v58, %v1365_v1  ;;  %vm1374_vm9 = vweird.f32 %v1668_v58 }
0x11cf   :  { %1669 = vrsqrt.f32 %v1366_v59  ;;  %vm1375_vm15 = vmor %vm1373_vm14, %vm1374_vm9  ;;  %vm1383_vm2 = vweird.f32 %v1366_v59 }
0x11d0   :  { %v1369_v48 = vmul.f32 %v1668_v58, %v1368_v60 }
0x11d2   :  { %v1370_v11 = vmul.f32 0.5, %v1369_v48 }
0x11d4   :  { %v1371_v40 = vsub.f32 1.5, %v1370_v11 }
0x11d5   :  { %v1670_v45 = vpop.eup %1669 }
0x11d6   :  { %v1372_v42 = vmul.f32 %v1668_v58, %v1371_v40  ;;  %v1378_v50 = vmul.f32 %v1670_v45, %v1366_v59  ;;  %vm1384_vm1 = vweird.f32 %v1670_v45 }
0x11d7   :  { %vm1385_vm3 = vmor %vm1383_vm2, %vm1384_vm1 }
0x11d8   :  { %v1376_v28 = vsel %vm1375_vm15, %v1668_v58, %v1372_v42  ;;  %v1379_v49 = vmul.f32 %v1670_v45, %v1378_v50 }
0x11d9   :  { %v1387_v54 = vmul.f32 %v1376_v28, %v1353_v46 }
0x11da   :  { %v1380_v15 = vmul.f32 0.5, %v1379_v49 }
0x11db   :  { %v1390_v5 = vmul.f32 %v1583_v52, %v1387_v54 }
0x11dc   :  { %v1381_v23 = vsub.f32 1.5, %v1380_v15 }
0x11dd   :  { %v1393_v22 = vadd.f32 %v1584_v10, %v1390_v5 }
0x11de   :  { %v1382_v37 = vmul.f32 %v1670_v45, %v1381_v23 }
0x11df   :  { %1395 = vst.msk [vmem:[#allocation5] sm:$0xff] %vm96_vm0, %v1393_v22 }
0x11e0   :  { %v1386_v61 = vsel %vm1385_vm3, %v1670_v45, %v1382_v37 }
0x11e1   :  { %v1388_v0 = vmul.f32 %v1386_v61, %v1354_v9 }
0x11e3   :  { %v1391_v62 = vmul.f32 %v1583_v52, %v1388_v0 }
0x11e5   :  { %v1394_v25 = vadd.f32 %v1584_v10, %v1391_v62 }
0x11e7   :  { %1396 = vst.msk [vmem:[#allocation5 + $0x8] sm:$0xff] %vm96_vm0, %v1394_v25 }
0x11e8   :  { %1409 = dma.vmem_to_hbm [thread:$0]  %s1402_s30, 256, %s1404_s8, [#allocation4], %s1738_s5, %s1738_s5, %s1739_s9  }
0x11e9   :  { %1729 = dma.done.wait [#allocation4], 256  }
0x11ea   :  { %1730 = vsyncadd [#allocation4], 4294967040 }
0x11eb   :  { %1414 = vsyncpa [#allocation3], 1 }
0x11ec   :  { %1415 = vsyncpa [#allocation4], 1 }

</bundles_post_ra>
